<compile_context>
chip_gen: v6e
topology: v6e:2x2x1
jax: 0.10.0
libtpu: 0.0.40
codegen_flags: <defaults>
</compile_context>

<pallas_src>
import functools

import jax
import jax.numpy as jnp
import numpy as np
from jax.experimental import pallas as pl
from jax.experimental.pallas import tpu as pltpu

_LANE = 128


def _chowder_kernel(x_ref, w_att_ref, w_top_ref, w_bot_ref, b_att_ref, b_cls_ref,
                    pred_ref, scores_ref,
                    top_cand_ref, bot_cand_ref,
                    *, n_top, n_bottom):
    """
    x_ref:        (b_tile, n_tile, F)  VMEM, native dtype   streamed x block
    w_att_ref:    (1, F)               VMEM, native dtype   Conv1d(k=1) weight (resident)
    w_top_ref:    (1, CPAD)            VMEM f32             Linear weights for top-k (padded)
    w_bot_ref:    (1, CPAD)            VMEM f32             Linear weights for bottom-k (padded)
    b_att_ref:    (1,)                 SMEM f32             Conv1d bias
    b_cls_ref:    (1,)                 SMEM f32             Linear bias
    pred_ref:     (b_tile, 1)          VMEM f32  output, resident across the n axis
    scores_ref:   (b_tile, n_tile)     VMEM f32  output block for this (b, n) step
    top_cand_ref: (b_tile, CPAD)       VMEM f32  running top-k candidates (desc, -inf pad)
    bot_cand_ref: (b_tile, CPAD)       VMEM f32  running bottom-k candidates (asc, +inf pad)
    """
    ni = pl.program_id(1)
    last_n = pl.num_programs(1) - 1

    b_tile, n_tile, _ = x_ref.shape
    cpad = top_cand_ref.shape[1]
    neg_inf = jnp.float32(-jnp.inf)
    pos_inf = jnp.float32(jnp.inf)

    # ---- Conv1d(k=1): scores for this (b, n) block --------------------------
    # Contract the trailing F axis of both operands (w (1,F) . x_b (n_tile,F)^T)
    # so the streamed x block is never transposed; each (1, n_tile) MXU result
    # is stored straight into the lane-dense scores output block.
    w_row = w_att_ref[...]                                   # (1, F)
    bias = b_att_ref[0]
    for b in range(b_tile):                                  # b_tile <= 8, unrolled
        row = jax.lax.dot_general(
            w_row, x_ref[b],
            dimension_numbers=(((1,), (1,)), ((), ())),
            preferred_element_type=jnp.float32)              # (1, n_tile) f32
        scores_ref[pl.ds(b, 1), :] = row + bias

    # ---- streaming top-k / bottom-k merge ------------------------------------
    @pl.when(ni == 0)
    def _init():
        top_cand_ref[...] = jnp.full_like(top_cand_ref, neg_inf)
        bot_cand_ref[...] = jnp.full_like(bot_cand_ref, pos_inf)

    blk = scores_ref[...]                                    # (b_tile, n_tile) f32, complete
    width = cpad + n_tile
    col = jax.lax.broadcasted_iota(jnp.int32, (b_tile, width), 1)
    lane_c = jax.lax.broadcasted_iota(jnp.int32, (b_tile, cpad), 1)

    # NOTE: iterative extraction assumes finite scores (no NaNs); ties resolve
    # to the lowest index (values, and hence the prediction, match torch.topk).

    # top-k: merge running candidates with this block, re-extract (descending).
    s_work = jnp.concatenate([top_cand_ref[...], blk], axis=1)       # (b_tile, width)
    new_top = jnp.full((b_tile, cpad), neg_inf, jnp.float32)
    for i in range(n_top):
        v = jnp.max(s_work, axis=1, keepdims=True)                   # (b_tile, 1)
        idx = jnp.min(jnp.where(s_work == v, col, width), axis=1, keepdims=True)
        s_work = jnp.where(col == idx, neg_inf, s_work)
        new_top = jnp.where(lane_c == i, v, new_top)
    top_cand_ref[...] = new_top

    # bottom-k: ascending.
    s_work = jnp.concatenate([bot_cand_ref[...], blk], axis=1)
    new_bot = jnp.full((b_tile, cpad), pos_inf, jnp.float32)
    for j in range(n_bottom):
        v = jnp.min(s_work, axis=1, keepdims=True)
        idx = jnp.min(jnp.where(s_work == v, col, width), axis=1, keepdims=True)
        s_work = jnp.where(col == idx, pos_inf, s_work)
        new_bot = jnp.where(lane_c == j, v, new_bot)
    bot_cand_ref[...] = new_bot

    # ---- classification head: once per batch tile, on candidates only -------
    @pl.when(ni == last_n)
    def _finalize():
        tvals = jnp.where(lane_c < n_top, top_cand_ref[...], 0.0)    # zero out +/-inf pads
        bvals = jnp.where(lane_c < n_bottom, bot_cand_ref[...], 0.0)
        pred = (jnp.sum(tvals * w_top_ref[...], axis=1, keepdims=True)
                + jnp.sum(bvals * w_bot_ref[...], axis=1, keepdims=True)
                + b_cls_ref[0])
        pred_ref[...] = pred


def _vmem_capacity_bytes():
    try:
        info = pltpu.get_tpu_info()
        cap = getattr(info, "vmem_capacity_bytes", None)
        if cap:
            return int(cap)
    except Exception:
        pass
    return 64 << 20          # conservative default (v7x per-TensorCore VMEM)


def chowder_forward(x, w_att, b_att, w_cls, b_cls, *, n_top, n_bottom,
                    n_tile=None, b_tile=None):
    """x: (B, N, F) float32 or bfloat16. Returns (prediction (B,1) f32, scores (B,N) f32)."""
    B, N, F = x.shape
    K = n_top + n_bottom
    assert w_att.shape == (F,) and w_cls.shape == (K,)
    assert b_att.shape == (1,) and b_cls.shape == (1,)
    assert 1 <= n_top <= N and 1 <= n_bottom <= N

    # Stream x in its native dtype (no HBM up-cast pass); only exotic dtypes get cast.
    if np.dtype(x.dtype) not in (np.dtype(np.float32), np.dtype(jnp.bfloat16)):
        x = x.astype(jnp.float32)
    dsize = np.dtype(x.dtype).itemsize

    cpad = max(_LANE, ((max(n_top, n_bottom) + _LANE - 1) // _LANE) * _LANE)

    # ---- batch tiling: b_tile multiple of 8 sublanes, or the full batch ------
    pad_b = 0
    if b_tile is None:
        if B <= 8:
            b_tile = B
        elif B % 8 == 0:
            b_tile = 8                       # >= 2 batch steps -> v7x megacore
        else:
            pad_b = (-B) % 8                 # pad batch; outputs sliced back below
            b_tile = 8
    else:
        assert (b_tile == B or b_tile % 8 == 0) and B % b_tile == 0
    Bp = B + pad_b
    if pad_b:
        x = jnp.pad(x, ((0, pad_b), (0, 0), (0, 0)))

    # ---- VMEM budget (per generation) & N tiling -----------------------------
    vmem_phys = _vmem_capacity_bytes()
    usable = (min(vmem_phys, 128 << 20) * 3) // 4      # ~48 MiB v7x, ~96 MiB v5e/v6e

    def _estimate(nt):
        x_blk = 2 * b_tile * nt * F * dsize                       # double-buffered x
        s_blk = 2 * b_tile * nt * 4                               # double-buffered scores
        resident = 2 * (F * dsize + 2 * cpad * 4 + b_tile * 4)    # w_att, w_top/bot, pred
        scratch = 2 * b_tile * cpad * 4                           # candidate buffers
        work = 8 * b_tile * (nt + cpad) * 4                       # in-kernel temporaries
        return x_blk + s_blk + resident + scratch + work

    if n_tile is None:
        cands = sorted({N} | {c for c in range(_LANE, N, _LANE) if N % c == 0},
                       reverse=True)
        n_tile = next((c for c in cands if _estimate(c) <= usable), None)
        if n_tile is None:
            raise ValueError(f"no VMEM-feasible n_tile for N={N}, F={F}, b_tile={b_tile}")
    else:
        assert N % n_tile == 0 and (n_tile == N or n_tile % _LANE == 0)

    vmem_limit = int(max(16 << 20,
                         min((min(vmem_phys, 128 << 20) * 7) // 8,
                             _estimate(n_tile) + (2 << 20))))

    grid = (Bp // b_tile, N // n_tile)

    # Linear-head weights, padded to lane width (zeros beyond n_top / n_bottom).
    w_cls32 = w_cls.astype(jnp.float32)
    w_top_pad = jnp.zeros((1, cpad), jnp.float32).at[0, :n_top].set(w_cls32[:n_top])
    w_bot_pad = jnp.zeros((1, cpad), jnp.float32).at[0, :n_bottom].set(w_cls32[n_top:])

    kernel = functools.partial(_chowder_kernel, n_top=n_top, n_bottom=n_bottom)
    pred, scores = pl.pallas_call(
        kernel,
        grid=grid,
        out_shape=(jax.ShapeDtypeStruct((Bp, 1), jnp.float32),
                   jax.ShapeDtypeStruct((Bp, N), jnp.float32)),
        in_specs=[
            pl.BlockSpec((b_tile, n_tile, F), lambda b, n: (b, n, 0)),   # x (native dtype)
            pl.BlockSpec((1, F), lambda b, n: (0, 0)),                   # w_att (resident)
            pl.BlockSpec((1, cpad), lambda b, n: (0, 0)),                # w_cls top (resident)
            pl.BlockSpec((1, cpad), lambda b, n: (0, 0)),                # w_cls bottom (resident)
            pl.BlockSpec(memory_space=pltpu.MemorySpace.SMEM),           # b_att
            pl.BlockSpec(memory_space=pltpu.MemorySpace.SMEM),           # b_cls
        ],
        out_specs=(
            pl.BlockSpec((b_tile, 1), lambda b, n: (b, 0)),              # pred (resident over n)
            pl.BlockSpec((b_tile, n_tile), lambda b, n: (b, n)),         # scores
        ),
        scratch_shapes=[pltpu.VMEM((b_tile, cpad), jnp.float32),         # running top-k
                        pltpu.VMEM((b_tile, cpad), jnp.float32)],        # running bottom-k
        compiler_params=pltpu.CompilerParams(
            dimension_semantics=("parallel", "arbitrary"),
            vmem_limit_bytes=vmem_limit),
    )(x,
      w_att.reshape(1, F).astype(x.dtype),
      w_top_pad, w_bot_pad,
      b_att.astype(jnp.float32),
      b_cls.astype(jnp.float32))

    if pad_b:
        pred = pred[:B]
        scores = scores[:B]
    return pred, scores


def chowder_reference(x, w_att, b_att, w_cls, b_cls, *, n_top, n_bottom):
    """Plain-JAX reference mirroring the PyTorch forward."""
    scores = jnp.einsum('bnf,f->bn', x.astype(jnp.float32),
                        w_att.astype(jnp.float32)) + b_att[0]
    top = jax.lax.top_k(scores, n_top)[0]                            # descending
    bottom = -jax.lax.top_k(-scores, n_bottom)[0]                    # ascending
    extreme = jnp.concatenate([top, bottom], axis=1)                 # (B, K)
    pred = extreme @ w_cls.astype(jnp.float32)[:, None] + b_cls[0]   # (B, 1)
    return pred, scores


if __name__ == "__main__":
    key = jax.random.PRNGKey(0)
    kx, kw1, kb1, kw2, kb2, kx3, kx4, kx5 = jax.random.split(key, 8)

    n_top, n_bottom = 10, 10
    K = n_top + n_bottom
    b_att = jax.random.normal(kb1, (1,), jnp.float32) * 0.1
    w_cls = jax.random.normal(kw2, (K,), jnp.float32) * (1.0 / np.sqrt(K))
    b_cls = jax.random.normal(kb2, (1,), jnp.float32) * 0.1

    def check(x, w_att, *, rtol=1e-4, atol=1e-4, **kw):
        pred, scores = chowder_forward(x, w_att, b_att, w_cls, b_cls,
                                       n_top=n_top, n_bottom=n_bottom, **kw)
        jax.block_until_ready((pred, scores))
        pred_g, scores_g = chowder_reference(x, w_att, b_att, w_cls, b_cls,
                                             n_top=n_top, n_bottom=n_bottom)
        np.testing.assert_allclose(np.asarray(scores), np.asarray(scores_g),
                                   rtol=rtol, atol=atol)
        np.testing.assert_allclose(np.asarray(pred), np.asarray(pred_g),
                                   rtol=rtol, atol=atol)

    # 1) f32, explicit n_tile=256 -> grid (1, 2): exercises the streaming
    #    top-k / bottom-k merge across N blocks.
    B, N, F = 2, 512, 256
    x = jax.random.normal(kx, (B, N, F), jnp.float32)
    w_att = jax.random.normal(kw1, (F,), jnp.float32) * (1.0 / np.sqrt(F))
    check(x, w_att, n_tile=256)

    # 2) same inputs, auto tiling (single full-N block).
    check(x, w_att)

    # 3) multi-block batch axis: B=16 -> b_tile=8, two "parallel" batch steps.
    B3, N3, F3 = 16, 256, 128
    x3 = jax.random.normal(kx3, (B3, N3, F3), jnp.float32)
    w_att3 = jax.random.normal(kw1, (F3,), jnp.float32) * (1.0 / np.sqrt(F3))
    check(x3, w_att3)

    # 4) native bf16 streaming (no f32 up-cast of x), three N blocks.
    B4, N4, F4 = 2, 384, 128
    x4 = jax.random.normal(kx4, (B4, N4, F4), jnp.float32).astype(jnp.bfloat16)
    w_att4 = (jax.random.normal(kw1, (F4,), jnp.float32)
              * (1.0 / np.sqrt(F4))).astype(jnp.bfloat16)
    check(x4, w_att4, n_tile=128, rtol=2e-2, atol=2e-2)

    # 5) batch not a multiple of 8 (B=10) -> padded to 16 internally, sliced back.
    B5, N5, F5 = 10, 128, 128
    x5 = jax.random.normal(kx5, (B5, N5, F5), jnp.float32)
    w_att5 = jax.random.normal(kw1, (F5,), jnp.float32) * (1.0 / np.sqrt(F5))
    check(x5, w_att5)

    print("KERNEL_OK")
</pallas_src>

<mosaic_0001>
module attributes {stable_mosaic.version = 11 : i64} {
  func.func @_chowder_kernel(%arg0: i32, %arg1: i32, %arg2: memref<2x256x256xf32, #tpu.memory_space<vmem>>, %arg3: memref<1x256xf32, #tpu.memory_space<vmem>>, %arg4: memref<1x128xf32, #tpu.memory_space<vmem>>, %arg5: memref<1x128xf32, #tpu.memory_space<vmem>>, %arg6: memref<1xf32, #tpu.memory_space<smem>>, %arg7: memref<1xf32, #tpu.memory_space<smem>>, %arg8: memref<2x1xf32, #tpu.memory_space<vmem>>, %arg9: memref<2x256xf32, #tpu.memory_space<vmem>>, %arg10: memref<2x128xf32, #tpu.memory_space<vmem>>, %arg11: memref<2x128xf32, #tpu.memory_space<vmem>>) attributes {dimension_semantics = [#tpu.dimension_semantics<parallel>, #tpu.dimension_semantics<arbitrary>], iteration_bounds = array<i64: 1, 2>, scalar_prefetch = 0 : i64, scratch_operands = 2 : i64, tpu.core_type = #tpu.core_type<tc>, window_params = [{transform_indices = @transform_0, window_bounds = array<i64: 2, 256, 256>}, {pipeline_mode = #tpu.pipeline_mode<synchronous>, transform_indices = @transform_1, window_bounds = array<i64: 1, 256>}, {pipeline_mode = #tpu.pipeline_mode<synchronous>, transform_indices = @transform_2, window_bounds = array<i64: 1, 128>}, {pipeline_mode = #tpu.pipeline_mode<synchronous>, transform_indices = @transform_3, window_bounds = array<i64: 1, 128>}, {transform_indices = @transform_4, window_bounds = array<i64: 1>}, {transform_indices = @transform_5, window_bounds = array<i64: 1>}, {transform_indices = @transform_6, window_bounds = array<i64: 2, 1>}, {transform_indices = @transform_7, window_bounds = array<i64: 2, 256>}]} {
    %c0 = arith.constant 0 : index
    %c0_0 = arith.constant 0 : index
    %0 = vector.load %arg3[%c0, %c0_0] : memref<1x256xf32, #tpu.memory_space<vmem>>, vector<1x256xf32>
    %c0_1 = arith.constant 0 : index
    %1 = memref.load %arg6[%c0_1] : memref<1xf32, #tpu.memory_space<smem>>
    %c0_2 = arith.constant 0 : index
    %c0_3 = arith.constant 0 : index
    %c0_4 = arith.constant 0 : index
    %2 = vector.load %arg2[%c0_2, %c0_3, %c0_4] : memref<2x256x256xf32, #tpu.memory_space<vmem>>, vector<1x256x256xf32>
    %3 = vector.shape_cast %2 : vector<1x256x256xf32> to vector<256x256xf32>
    %cst = arith.constant dense<0.000000e+00> : vector<1x256xf32>
    %4 = tpu.matmul %0, %3, %cst {dimension_numbers = #tpu.dot_dimension_numbers<[1], [1], [0], [0], [0, 0, 1, 0], [], []>} : vector<1x256xf32>, vector<256x256xf32>, vector<1x256xf32> -> vector<1x256xf32>
    %5 = vector.broadcast %1 : f32 to vector<1x256xf32>
    %6 = arith.addf %4, %5 : vector<1x256xf32>
    %c0_5 = arith.constant 0 : index
    %c0_6 = arith.constant 0 : index
    %7 = vector.load %arg9[%c0_5, %c0_6] : memref<2x256xf32, #tpu.memory_space<vmem>>, vector<1x256xf32>
    tpu.vector_store %arg9[%c0_5, %c0_6], %6 {strides = array<i32>} : memref<2x256xf32, #tpu.memory_space<vmem>>, vector<1x256xf32>,
    %c1 = arith.constant 1 : index
    %c0_7 = arith.constant 0 : index
    %c0_8 = arith.constant 0 : index
    %8 = vector.load %arg2[%c1, %c0_7, %c0_8] : memref<2x256x256xf32, #tpu.memory_space<vmem>>, vector<1x256x256xf32>
    %9 = vector.shape_cast %8 : vector<1x256x256xf32> to vector<256x256xf32>
    %cst_9 = arith.constant dense<0.000000e+00> : vector<1x256xf32>
    %10 = tpu.matmul %0, %9, %cst_9 {dimension_numbers = #tpu.dot_dimension_numbers<[1], [1], [0], [0], [0, 0, 1, 0], [], []>} : vector<1x256xf32>, vector<256x256xf32>, vector<1x256xf32> -> vector<1x256xf32>
    %11 = vector.broadcast %1 : f32 to vector<1x256xf32>
    %12 = arith.addf %10, %11 : vector<1x256xf32>
    %c1_10 = arith.constant 1 : index
    %c0_11 = arith.constant 0 : index
    %13 = vector.load %arg9[%c1_10, %c0_11] : memref<2x256xf32, #tpu.memory_space<vmem>>, vector<1x256xf32>
    tpu.vector_store %arg9[%c1_10, %c0_11], %12 {strides = array<i32>} : memref<2x256xf32, #tpu.memory_space<vmem>>, vector<1x256xf32>,
    %c0_i32 = arith.constant 0 : i32
    %14 = arith.cmpi eq, %arg1, %c0_i32 : i32
    %15 = arith.extui %14 : i1 to i32
    %cst_12 = arith.constant 0xFF800000 : f32
    %cst_13 = arith.constant 0x7F800000 : f32
    %c0_i32_14 = arith.constant 0 : i32
    %16 = arith.cmpi ne, %15, %c0_i32_14 : i32
    scf.if %16 {
      %351 = vector.broadcast %cst_12 : f32 to vector<2x128xf32>
      %c0_113 = arith.constant 0 : index
      %c0_114 = arith.constant 0 : index
      %352 = vector.load %arg10[%c0_113, %c0_114] : memref<2x128xf32, #tpu.memory_space<vmem>>, vector<2x128xf32>
      tpu.vector_store %arg10[%c0_113, %c0_114], %351 {strides = array<i32>} : memref<2x128xf32, #tpu.memory_space<vmem>>, vector<2x128xf32>,
      %353 = vector.broadcast %cst_13 : f32 to vector<2x128xf32>
      %c0_115 = arith.constant 0 : index
      %c0_116 = arith.constant 0 : index
      %354 = vector.load %arg11[%c0_115, %c0_116] : memref<2x128xf32, #tpu.memory_space<vmem>>, vector<2x128xf32>
      tpu.vector_store %arg11[%c0_115, %c0_116], %353 {strides = array<i32>} : memref<2x128xf32, #tpu.memory_space<vmem>>, vector<2x128xf32>,
    } else {
    }
    %c0_15 = arith.constant 0 : index
    %c0_16 = arith.constant 0 : index
    %17 = vector.load %arg9[%c0_15, %c0_16] : memref<2x256xf32, #tpu.memory_space<vmem>>, vector<2x256xf32>
    %18 = tpu.iota {dimensions = array<i32: 1>} : vector<2x384xi32>
    %19 = tpu.iota {dimensions = array<i32: 1>} : vector<2x128xi32>
    %c0_17 = arith.constant 0 : index
    %c0_18 = arith.constant 0 : index
    %20 = vector.load %arg10[%c0_17, %c0_18] : memref<2x128xf32, #tpu.memory_space<vmem>>, vector<2x128xf32>
    %21 = tpu.concatenate %20, %17 in 1 : vector<2x128xf32>, vector<2x256xf32> -> vector<2x384xf32>
    %cst_19 = arith.constant 0xFF800000 : f32
    %22 = vector.broadcast %cst_19 : f32 to vector<2x128xf32>
    %cst_20 = arith.constant dense<0xFF800000> : vector<2xf32>
    %23 = vector.multi_reduction <maximumf>, %21, %cst_20 [1] : vector<2x384xf32> to vector<2xf32>
    %24 = vector.shape_cast %23 : vector<2xf32> to vector<2x1xf32>
    %25 = vector.broadcast %24 : vector<2x1xf32> to vector<2x384xf32>
    %26 = arith.cmpf oeq, %21, %25 : vector<2x384xf32>
    %c384_i32 = arith.constant 384 : i32
    %27 = vector.broadcast %c384_i32 : i32 to vector<2x384xi32>
    %28 = arith.select %26, %18, %27 : vector<2x384xi1>, vector<2x384xi32>
    %cst_21 = arith.constant dense<2147483647> : vector<2xi32>
    %29 = vector.multi_reduction <minsi>, %28, %cst_21 [1] : vector<2x384xi32> to vector<2xi32>
    %30 = vector.shape_cast %29 : vector<2xi32> to vector<2x1xi32>
    %31 = vector.broadcast %30 : vector<2x1xi32> to vector<2x384xi32>
    %32 = arith.cmpi eq, %18, %31 : vector<2x384xi32>
    %cst_22 = arith.constant 0xFF800000 : f32
    %33 = vector.broadcast %cst_22 : f32 to vector<2x384xf32>
    %34 = arith.select %32, %33, %21 : vector<2x384xi1>, vector<2x384xf32>
    %c0_i32_23 = arith.constant 0 : i32
    %35 = vector.broadcast %c0_i32_23 : i32 to vector<2x128xi32>
    %36 = arith.cmpi eq, %19, %35 : vector<2x128xi32>
    %37 = vector.shape_cast %24 : vector<2x1xf32> to vector<2x1xf32>
    %38 = vector.broadcast %37 : vector<2x1xf32> to vector<2x128xf32>
    %39 = arith.select %36, %38, %22 : vector<2x128xi1>, vector<2x128xf32>
    %cst_24 = arith.constant dense<0xFF800000> : vector<2xf32>
    %40 = vector.multi_reduction <maximumf>, %34, %cst_24 [1] : vector<2x384xf32> to vector<2xf32>
    %41 = vector.shape_cast %40 : vector<2xf32> to vector<2x1xf32>
    %42 = vector.broadcast %41 : vector<2x1xf32> to vector<2x384xf32>
    %43 = arith.cmpf oeq, %34, %42 : vector<2x384xf32>
    %c384_i32_25 = arith.constant 384 : i32
    %44 = vector.broadcast %c384_i32_25 : i32 to vector<2x384xi32>
    %45 = arith.select %43, %18, %44 : vector<2x384xi1>, vector<2x384xi32>
    %cst_26 = arith.constant dense<2147483647> : vector<2xi32>
    %46 = vector.multi_reduction <minsi>, %45, %cst_26 [1] : vector<2x384xi32> to vector<2xi32>
    %47 = vector.shape_cast %46 : vector<2xi32> to vector<2x1xi32>
    %48 = vector.broadcast %47 : vector<2x1xi32> to vector<2x384xi32>
    %49 = arith.cmpi eq, %18, %48 : vector<2x384xi32>
    %cst_27 = arith.constant 0xFF800000 : f32
    %50 = vector.broadcast %cst_27 : f32 to vector<2x384xf32>
    %51 = arith.select %49, %50, %34 : vector<2x384xi1>, vector<2x384xf32>
    %c1_i32 = arith.constant 1 : i32
    %52 = vector.broadcast %c1_i32 : i32 to vector<2x128xi32>
    %53 = arith.cmpi eq, %19, %52 : vector<2x128xi32>
    %54 = vector.shape_cast %41 : vector<2x1xf32> to vector<2x1xf32>
    %55 = vector.broadcast %54 : vector<2x1xf32> to vector<2x128xf32>
    %56 = arith.select %53, %55, %39 : vector<2x128xi1>, vector<2x128xf32>
    %cst_28 = arith.constant dense<0xFF800000> : vector<2xf32>
    %57 = vector.multi_reduction <maximumf>, %51, %cst_28 [1] : vector<2x384xf32> to vector<2xf32>
    %58 = vector.shape_cast %57 : vector<2xf32> to vector<2x1xf32>
    %59 = vector.broadcast %58 : vector<2x1xf32> to vector<2x384xf32>
    %60 = arith.cmpf oeq, %51, %59 : vector<2x384xf32>
    %c384_i32_29 = arith.constant 384 : i32
    %61 = vector.broadcast %c384_i32_29 : i32 to vector<2x384xi32>
    %62 = arith.select %60, %18, %61 : vector<2x384xi1>, vector<2x384xi32>
    %cst_30 = arith.constant dense<2147483647> : vector<2xi32>
    %63 = vector.multi_reduction <minsi>, %62, %cst_30 [1] : vector<2x384xi32> to vector<2xi32>
    %64 = vector.shape_cast %63 : vector<2xi32> to vector<2x1xi32>
    %65 = vector.broadcast %64 : vector<2x1xi32> to vector<2x384xi32>
    %66 = arith.cmpi eq, %18, %65 : vector<2x384xi32>
    %cst_31 = arith.constant 0xFF800000 : f32
    %67 = vector.broadcast %cst_31 : f32 to vector<2x384xf32>
    %68 = arith.select %66, %67, %51 : vector<2x384xi1>, vector<2x384xf32>
    %c2_i32 = arith.constant 2 : i32
    %69 = vector.broadcast %c2_i32 : i32 to vector<2x128xi32>
    %70 = arith.cmpi eq, %19, %69 : vector<2x128xi32>
    %71 = vector.shape_cast %58 : vector<2x1xf32> to vector<2x1xf32>
    %72 = vector.broadcast %71 : vector<2x1xf32> to vector<2x128xf32>
    %73 = arith.select %70, %72, %56 : vector<2x128xi1>, vector<2x128xf32>
    %cst_32 = arith.constant dense<0xFF800000> : vector<2xf32>
    %74 = vector.multi_reduction <maximumf>, %68, %cst_32 [1] : vector<2x384xf32> to vector<2xf32>
    %75 = vector.shape_cast %74 : vector<2xf32> to vector<2x1xf32>
    %76 = vector.broadcast %75 : vector<2x1xf32> to vector<2x384xf32>
    %77 = arith.cmpf oeq, %68, %76 : vector<2x384xf32>
    %c384_i32_33 = arith.constant 384 : i32
    %78 = vector.broadcast %c384_i32_33 : i32 to vector<2x384xi32>
    %79 = arith.select %77, %18, %78 : vector<2x384xi1>, vector<2x384xi32>
    %cst_34 = arith.constant dense<2147483647> : vector<2xi32>
    %80 = vector.multi_reduction <minsi>, %79, %cst_34 [1] : vector<2x384xi32> to vector<2xi32>
    %81 = vector.shape_cast %80 : vector<2xi32> to vector<2x1xi32>
    %82 = vector.broadcast %81 : vector<2x1xi32> to vector<2x384xi32>
    %83 = arith.cmpi eq, %18, %82 : vector<2x384xi32>
    %cst_35 = arith.constant 0xFF800000 : f32
    %84 = vector.broadcast %cst_35 : f32 to vector<2x384xf32>
    %85 = arith.select %83, %84, %68 : vector<2x384xi1>, vector<2x384xf32>
    %c3_i32 = arith.constant 3 : i32
    %86 = vector.broadcast %c3_i32 : i32 to vector<2x128xi32>
    %87 = arith.cmpi eq, %19, %86 : vector<2x128xi32>
    %88 = vector.shape_cast %75 : vector<2x1xf32> to vector<2x1xf32>
    %89 = vector.broadcast %88 : vector<2x1xf32> to vector<2x128xf32>
    %90 = arith.select %87, %89, %73 : vector<2x128xi1>, vector<2x128xf32>
    %cst_36 = arith.constant dense<0xFF800000> : vector<2xf32>
    %91 = vector.multi_reduction <maximumf>, %85, %cst_36 [1] : vector<2x384xf32> to vector<2xf32>
    %92 = vector.shape_cast %91 : vector<2xf32> to vector<2x1xf32>
    %93 = vector.broadcast %92 : vector<2x1xf32> to vector<2x384xf32>
    %94 = arith.cmpf oeq, %85, %93 : vector<2x384xf32>
    %c384_i32_37 = arith.constant 384 : i32
    %95 = vector.broadcast %c384_i32_37 : i32 to vector<2x384xi32>
    %96 = arith.select %94, %18, %95 : vector<2x384xi1>, vector<2x384xi32>
    %cst_38 = arith.constant dense<2147483647> : vector<2xi32>
    %97 = vector.multi_reduction <minsi>, %96, %cst_38 [1] : vector<2x384xi32> to vector<2xi32>
    %98 = vector.shape_cast %97 : vector<2xi32> to vector<2x1xi32>
    %99 = vector.broadcast %98 : vector<2x1xi32> to vector<2x384xi32>
    %100 = arith.cmpi eq, %18, %99 : vector<2x384xi32>
    %cst_39 = arith.constant 0xFF800000 : f32
    %101 = vector.broadcast %cst_39 : f32 to vector<2x384xf32>
    %102 = arith.select %100, %101, %85 : vector<2x384xi1>, vector<2x384xf32>
    %c4_i32 = arith.constant 4 : i32
    %103 = vector.broadcast %c4_i32 : i32 to vector<2x128xi32>
    %104 = arith.cmpi eq, %19, %103 : vector<2x128xi32>
    %105 = vector.shape_cast %92 : vector<2x1xf32> to vector<2x1xf32>
    %106 = vector.broadcast %105 : vector<2x1xf32> to vector<2x128xf32>
    %107 = arith.select %104, %106, %90 : vector<2x128xi1>, vector<2x128xf32>
    %cst_40 = arith.constant dense<0xFF800000> : vector<2xf32>
    %108 = vector.multi_reduction <maximumf>, %102, %cst_40 [1] : vector<2x384xf32> to vector<2xf32>
    %109 = vector.shape_cast %108 : vector<2xf32> to vector<2x1xf32>
    %110 = vector.broadcast %109 : vector<2x1xf32> to vector<2x384xf32>
    %111 = arith.cmpf oeq, %102, %110 : vector<2x384xf32>
    %c384_i32_41 = arith.constant 384 : i32
    %112 = vector.broadcast %c384_i32_41 : i32 to vector<2x384xi32>
    %113 = arith.select %111, %18, %112 : vector<2x384xi1>, vector<2x384xi32>
    %cst_42 = arith.constant dense<2147483647> : vector<2xi32>
    %114 = vector.multi_reduction <minsi>, %113, %cst_42 [1] : vector<2x384xi32> to vector<2xi32>
    %115 = vector.shape_cast %114 : vector<2xi32> to vector<2x1xi32>
    %116 = vector.broadcast %115 : vector<2x1xi32> to vector<2x384xi32>
    %117 = arith.cmpi eq, %18, %116 : vector<2x384xi32>
    %cst_43 = arith.constant 0xFF800000 : f32
    %118 = vector.broadcast %cst_43 : f32 to vector<2x384xf32>
    %119 = arith.select %117, %118, %102 : vector<2x384xi1>, vector<2x384xf32>
    %c5_i32 = arith.constant 5 : i32
    %120 = vector.broadcast %c5_i32 : i32 to vector<2x128xi32>
    %121 = arith.cmpi eq, %19, %120 : vector<2x128xi32>
    %122 = vector.shape_cast %109 : vector<2x1xf32> to vector<2x1xf32>
    %123 = vector.broadcast %122 : vector<2x1xf32> to vector<2x128xf32>
    %124 = arith.select %121, %123, %107 : vector<2x128xi1>, vector<2x128xf32>
    %cst_44 = arith.constant dense<0xFF800000> : vector<2xf32>
    %125 = vector.multi_reduction <maximumf>, %119, %cst_44 [1] : vector<2x384xf32> to vector<2xf32>
    %126 = vector.shape_cast %125 : vector<2xf32> to vector<2x1xf32>
    %127 = vector.broadcast %126 : vector<2x1xf32> to vector<2x384xf32>
    %128 = arith.cmpf oeq, %119, %127 : vector<2x384xf32>
    %c384_i32_45 = arith.constant 384 : i32
    %129 = vector.broadcast %c384_i32_45 : i32 to vector<2x384xi32>
    %130 = arith.select %128, %18, %129 : vector<2x384xi1>, vector<2x384xi32>
    %cst_46 = arith.constant dense<2147483647> : vector<2xi32>
    %131 = vector.multi_reduction <minsi>, %130, %cst_46 [1] : vector<2x384xi32> to vector<2xi32>
    %132 = vector.shape_cast %131 : vector<2xi32> to vector<2x1xi32>
    %133 = vector.broadcast %132 : vector<2x1xi32> to vector<2x384xi32>
    %134 = arith.cmpi eq, %18, %133 : vector<2x384xi32>
    %cst_47 = arith.constant 0xFF800000 : f32
    %135 = vector.broadcast %cst_47 : f32 to vector<2x384xf32>
    %136 = arith.select %134, %135, %119 : vector<2x384xi1>, vector<2x384xf32>
    %c6_i32 = arith.constant 6 : i32
    %137 = vector.broadcast %c6_i32 : i32 to vector<2x128xi32>
    %138 = arith.cmpi eq, %19, %137 : vector<2x128xi32>
    %139 = vector.shape_cast %126 : vector<2x1xf32> to vector<2x1xf32>
    %140 = vector.broadcast %139 : vector<2x1xf32> to vector<2x128xf32>
    %141 = arith.select %138, %140, %124 : vector<2x128xi1>, vector<2x128xf32>
    %cst_48 = arith.constant dense<0xFF800000> : vector<2xf32>
    %142 = vector.multi_reduction <maximumf>, %136, %cst_48 [1] : vector<2x384xf32> to vector<2xf32>
    %143 = vector.shape_cast %142 : vector<2xf32> to vector<2x1xf32>
    %144 = vector.broadcast %143 : vector<2x1xf32> to vector<2x384xf32>
    %145 = arith.cmpf oeq, %136, %144 : vector<2x384xf32>
    %c384_i32_49 = arith.constant 384 : i32
    %146 = vector.broadcast %c384_i32_49 : i32 to vector<2x384xi32>
    %147 = arith.select %145, %18, %146 : vector<2x384xi1>, vector<2x384xi32>
    %cst_50 = arith.constant dense<2147483647> : vector<2xi32>
    %148 = vector.multi_reduction <minsi>, %147, %cst_50 [1] : vector<2x384xi32> to vector<2xi32>
    %149 = vector.shape_cast %148 : vector<2xi32> to vector<2x1xi32>
    %150 = vector.broadcast %149 : vector<2x1xi32> to vector<2x384xi32>
    %151 = arith.cmpi eq, %18, %150 : vector<2x384xi32>
    %cst_51 = arith.constant 0xFF800000 : f32
    %152 = vector.broadcast %cst_51 : f32 to vector<2x384xf32>
    %153 = arith.select %151, %152, %136 : vector<2x384xi1>, vector<2x384xf32>
    %c7_i32 = arith.constant 7 : i32
    %154 = vector.broadcast %c7_i32 : i32 to vector<2x128xi32>
    %155 = arith.cmpi eq, %19, %154 : vector<2x128xi32>
    %156 = vector.shape_cast %143 : vector<2x1xf32> to vector<2x1xf32>
    %157 = vector.broadcast %156 : vector<2x1xf32> to vector<2x128xf32>
    %158 = arith.select %155, %157, %141 : vector<2x128xi1>, vector<2x128xf32>
    %cst_52 = arith.constant dense<0xFF800000> : vector<2xf32>
    %159 = vector.multi_reduction <maximumf>, %153, %cst_52 [1] : vector<2x384xf32> to vector<2xf32>
    %160 = vector.shape_cast %159 : vector<2xf32> to vector<2x1xf32>
    %161 = vector.broadcast %160 : vector<2x1xf32> to vector<2x384xf32>
    %162 = arith.cmpf oeq, %153, %161 : vector<2x384xf32>
    %c384_i32_53 = arith.constant 384 : i32
    %163 = vector.broadcast %c384_i32_53 : i32 to vector<2x384xi32>
    %164 = arith.select %162, %18, %163 : vector<2x384xi1>, vector<2x384xi32>
    %cst_54 = arith.constant dense<2147483647> : vector<2xi32>
    %165 = vector.multi_reduction <minsi>, %164, %cst_54 [1] : vector<2x384xi32> to vector<2xi32>
    %166 = vector.shape_cast %165 : vector<2xi32> to vector<2x1xi32>
    %167 = vector.broadcast %166 : vector<2x1xi32> to vector<2x384xi32>
    %168 = arith.cmpi eq, %18, %167 : vector<2x384xi32>
    %cst_55 = arith.constant 0xFF800000 : f32
    %169 = vector.broadcast %cst_55 : f32 to vector<2x384xf32>
    %170 = arith.select %168, %169, %153 : vector<2x384xi1>, vector<2x384xf32>
    %c8_i32 = arith.constant 8 : i32
    %171 = vector.broadcast %c8_i32 : i32 to vector<2x128xi32>
    %172 = arith.cmpi eq, %19, %171 : vector<2x128xi32>
    %173 = vector.shape_cast %160 : vector<2x1xf32> to vector<2x1xf32>
    %174 = vector.broadcast %173 : vector<2x1xf32> to vector<2x128xf32>
    %175 = arith.select %172, %174, %158 : vector<2x128xi1>, vector<2x128xf32>
    %cst_56 = arith.constant dense<0xFF800000> : vector<2xf32>
    %176 = vector.multi_reduction <maximumf>, %170, %cst_56 [1] : vector<2x384xf32> to vector<2xf32>
    %177 = vector.shape_cast %176 : vector<2xf32> to vector<2x1xf32>
    %c9_i32 = arith.constant 9 : i32
    %178 = vector.broadcast %c9_i32 : i32 to vector<2x128xi32>
    %179 = arith.cmpi eq, %19, %178 : vector<2x128xi32>
    %180 = vector.shape_cast %177 : vector<2x1xf32> to vector<2x1xf32>
    %181 = vector.broadcast %180 : vector<2x1xf32> to vector<2x128xf32>
    %182 = arith.select %179, %181, %175 : vector<2x128xi1>, vector<2x128xf32>
    %c0_57 = arith.constant 0 : index
    %c0_58 = arith.constant 0 : index
    %183 = vector.load %arg10[%c0_57, %c0_58] : memref<2x128xf32, #tpu.memory_space<vmem>>, vector<2x128xf32>
    tpu.vector_store %arg10[%c0_57, %c0_58], %182 {strides = array<i32>} : memref<2x128xf32, #tpu.memory_space<vmem>>, vector<2x128xf32>,
    %c0_59 = arith.constant 0 : index
    %c0_60 = arith.constant 0 : index
    %184 = vector.load %arg11[%c0_59, %c0_60] : memref<2x128xf32, #tpu.memory_space<vmem>>, vector<2x128xf32>
    %185 = tpu.concatenate %184, %17 in 1 : vector<2x128xf32>, vector<2x256xf32> -> vector<2x384xf32>
    %cst_61 = arith.constant 0x7F800000 : f32
    %186 = vector.broadcast %cst_61 : f32 to vector<2x128xf32>
    %cst_62 = arith.constant dense<0x7F800000> : vector<2xf32>
    %187 = vector.multi_reduction <minimumf>, %185, %cst_62 [1] : vector<2x384xf32> to vector<2xf32>
    %188 = vector.shape_cast %187 : vector<2xf32> to vector<2x1xf32>
    %189 = vector.broadcast %188 : vector<2x1xf32> to vector<2x384xf32>
    %190 = arith.cmpf oeq, %185, %189 : vector<2x384xf32>
    %c384_i32_63 = arith.constant 384 : i32
    %191 = vector.broadcast %c384_i32_63 : i32 to vector<2x384xi32>
    %192 = arith.select %190, %18, %191 : vector<2x384xi1>, vector<2x384xi32>
    %cst_64 = arith.constant dense<2147483647> : vector<2xi32>
    %193 = vector.multi_reduction <minsi>, %192, %cst_64 [1] : vector<2x384xi32> to vector<2xi32>
    %194 = vector.shape_cast %193 : vector<2xi32> to vector<2x1xi32>
    %195 = vector.broadcast %194 : vector<2x1xi32> to vector<2x384xi32>
    %196 = arith.cmpi eq, %18, %195 : vector<2x384xi32>
    %cst_65 = arith.constant 0x7F800000 : f32
    %197 = vector.broadcast %cst_65 : f32 to vector<2x384xf32>
    %198 = arith.select %196, %197, %185 : vector<2x384xi1>, vector<2x384xf32>
    %c0_i32_66 = arith.constant 0 : i32
    %199 = vector.broadcast %c0_i32_66 : i32 to vector<2x128xi32>
    %200 = arith.cmpi eq, %19, %199 : vector<2x128xi32>
    %201 = vector.shape_cast %188 : vector<2x1xf32> to vector<2x1xf32>
    %202 = vector.broadcast %201 : vector<2x1xf32> to vector<2x128xf32>
    %203 = arith.select %200, %202, %186 : vector<2x128xi1>, vector<2x128xf32>
    %cst_67 = arith.constant dense<0x7F800000> : vector<2xf32>
    %204 = vector.multi_reduction <minimumf>, %198, %cst_67 [1] : vector<2x384xf32> to vector<2xf32>
    %205 = vector.shape_cast %204 : vector<2xf32> to vector<2x1xf32>
    %206 = vector.broadcast %205 : vector<2x1xf32> to vector<2x384xf32>
    %207 = arith.cmpf oeq, %198, %206 : vector<2x384xf32>
    %c384_i32_68 = arith.constant 384 : i32
    %208 = vector.broadcast %c384_i32_68 : i32 to vector<2x384xi32>
    %209 = arith.select %207, %18, %208 : vector<2x384xi1>, vector<2x384xi32>
    %cst_69 = arith.constant dense<2147483647> : vector<2xi32>
    %210 = vector.multi_reduction <minsi>, %209, %cst_69 [1] : vector<2x384xi32> to vector<2xi32>
    %211 = vector.shape_cast %210 : vector<2xi32> to vector<2x1xi32>
    %212 = vector.broadcast %211 : vector<2x1xi32> to vector<2x384xi32>
    %213 = arith.cmpi eq, %18, %212 : vector<2x384xi32>
    %cst_70 = arith.constant 0x7F800000 : f32
    %214 = vector.broadcast %cst_70 : f32 to vector<2x384xf32>
    %215 = arith.select %213, %214, %198 : vector<2x384xi1>, vector<2x384xf32>
    %c1_i32_71 = arith.constant 1 : i32
    %216 = vector.broadcast %c1_i32_71 : i32 to vector<2x128xi32>
    %217 = arith.cmpi eq, %19, %216 : vector<2x128xi32>
    %218 = vector.shape_cast %205 : vector<2x1xf32> to vector<2x1xf32>
    %219 = vector.broadcast %218 : vector<2x1xf32> to vector<2x128xf32>
    %220 = arith.select %217, %219, %203 : vector<2x128xi1>, vector<2x128xf32>
    %cst_72 = arith.constant dense<0x7F800000> : vector<2xf32>
    %221 = vector.multi_reduction <minimumf>, %215, %cst_72 [1] : vector<2x384xf32> to vector<2xf32>
    %222 = vector.shape_cast %221 : vector<2xf32> to vector<2x1xf32>
    %223 = vector.broadcast %222 : vector<2x1xf32> to vector<2x384xf32>
    %224 = arith.cmpf oeq, %215, %223 : vector<2x384xf32>
    %c384_i32_73 = arith.constant 384 : i32
    %225 = vector.broadcast %c384_i32_73 : i32 to vector<2x384xi32>
    %226 = arith.select %224, %18, %225 : vector<2x384xi1>, vector<2x384xi32>
    %cst_74 = arith.constant dense<2147483647> : vector<2xi32>
    %227 = vector.multi_reduction <minsi>, %226, %cst_74 [1] : vector<2x384xi32> to vector<2xi32>
    %228 = vector.shape_cast %227 : vector<2xi32> to vector<2x1xi32>
    %229 = vector.broadcast %228 : vector<2x1xi32> to vector<2x384xi32>
    %230 = arith.cmpi eq, %18, %229 : vector<2x384xi32>
    %cst_75 = arith.constant 0x7F800000 : f32
    %231 = vector.broadcast %cst_75 : f32 to vector<2x384xf32>
    %232 = arith.select %230, %231, %215 : vector<2x384xi1>, vector<2x384xf32>
    %c2_i32_76 = arith.constant 2 : i32
    %233 = vector.broadcast %c2_i32_76 : i32 to vector<2x128xi32>
    %234 = arith.cmpi eq, %19, %233 : vector<2x128xi32>
    %235 = vector.shape_cast %222 : vector<2x1xf32> to vector<2x1xf32>
    %236 = vector.broadcast %235 : vector<2x1xf32> to vector<2x128xf32>
    %237 = arith.select %234, %236, %220 : vector<2x128xi1>, vector<2x128xf32>
    %cst_77 = arith.constant dense<0x7F800000> : vector<2xf32>
    %238 = vector.multi_reduction <minimumf>, %232, %cst_77 [1] : vector<2x384xf32> to vector<2xf32>
    %239 = vector.shape_cast %238 : vector<2xf32> to vector<2x1xf32>
    %240 = vector.broadcast %239 : vector<2x1xf32> to vector<2x384xf32>
    %241 = arith.cmpf oeq, %232, %240 : vector<2x384xf32>
    %c384_i32_78 = arith.constant 384 : i32
    %242 = vector.broadcast %c384_i32_78 : i32 to vector<2x384xi32>
    %243 = arith.select %241, %18, %242 : vector<2x384xi1>, vector<2x384xi32>
    %cst_79 = arith.constant dense<2147483647> : vector<2xi32>
    %244 = vector.multi_reduction <minsi>, %243, %cst_79 [1] : vector<2x384xi32> to vector<2xi32>
    %245 = vector.shape_cast %244 : vector<2xi32> to vector<2x1xi32>
    %246 = vector.broadcast %245 : vector<2x1xi32> to vector<2x384xi32>
    %247 = arith.cmpi eq, %18, %246 : vector<2x384xi32>
    %cst_80 = arith.constant 0x7F800000 : f32
    %248 = vector.broadcast %cst_80 : f32 to vector<2x384xf32>
    %249 = arith.select %247, %248, %232 : vector<2x384xi1>, vector<2x384xf32>
    %c3_i32_81 = arith.constant 3 : i32
    %250 = vector.broadcast %c3_i32_81 : i32 to vector<2x128xi32>
    %251 = arith.cmpi eq, %19, %250 : vector<2x128xi32>
    %252 = vector.shape_cast %239 : vector<2x1xf32> to vector<2x1xf32>
    %253 = vector.broadcast %252 : vector<2x1xf32> to vector<2x128xf32>
    %254 = arith.select %251, %253, %237 : vector<2x128xi1>, vector<2x128xf32>
    %cst_82 = arith.constant dense<0x7F800000> : vector<2xf32>
    %255 = vector.multi_reduction <minimumf>, %249, %cst_82 [1] : vector<2x384xf32> to vector<2xf32>
    %256 = vector.shape_cast %255 : vector<2xf32> to vector<2x1xf32>
    %257 = vector.broadcast %256 : vector<2x1xf32> to vector<2x384xf32>
    %258 = arith.cmpf oeq, %249, %257 : vector<2x384xf32>
    %c384_i32_83 = arith.constant 384 : i32
    %259 = vector.broadcast %c384_i32_83 : i32 to vector<2x384xi32>
    %260 = arith.select %258, %18, %259 : vector<2x384xi1>, vector<2x384xi32>
    %cst_84 = arith.constant dense<2147483647> : vector<2xi32>
    %261 = vector.multi_reduction <minsi>, %260, %cst_84 [1] : vector<2x384xi32> to vector<2xi32>
    %262 = vector.shape_cast %261 : vector<2xi32> to vector<2x1xi32>
    %263 = vector.broadcast %262 : vector<2x1xi32> to vector<2x384xi32>
    %264 = arith.cmpi eq, %18, %263 : vector<2x384xi32>
    %cst_85 = arith.constant 0x7F800000 : f32
    %265 = vector.broadcast %cst_85 : f32 to vector<2x384xf32>
    %266 = arith.select %264, %265, %249 : vector<2x384xi1>, vector<2x384xf32>
    %c4_i32_86 = arith.constant 4 : i32
    %267 = vector.broadcast %c4_i32_86 : i32 to vector<2x128xi32>
    %268 = arith.cmpi eq, %19, %267 : vector<2x128xi32>
    %269 = vector.shape_cast %256 : vector<2x1xf32> to vector<2x1xf32>
    %270 = vector.broadcast %269 : vector<2x1xf32> to vector<2x128xf32>
    %271 = arith.select %268, %270, %254 : vector<2x128xi1>, vector<2x128xf32>
    %cst_87 = arith.constant dense<0x7F800000> : vector<2xf32>
    %272 = vector.multi_reduction <minimumf>, %266, %cst_87 [1] : vector<2x384xf32> to vector<2xf32>
    %273 = vector.shape_cast %272 : vector<2xf32> to vector<2x1xf32>
    %274 = vector.broadcast %273 : vector<2x1xf32> to vector<2x384xf32>
    %275 = arith.cmpf oeq, %266, %274 : vector<2x384xf32>
    %c384_i32_88 = arith.constant 384 : i32
    %276 = vector.broadcast %c384_i32_88 : i32 to vector<2x384xi32>
    %277 = arith.select %275, %18, %276 : vector<2x384xi1>, vector<2x384xi32>
    %cst_89 = arith.constant dense<2147483647> : vector<2xi32>
    %278 = vector.multi_reduction <minsi>, %277, %cst_89 [1] : vector<2x384xi32> to vector<2xi32>
    %279 = vector.shape_cast %278 : vector<2xi32> to vector<2x1xi32>
    %280 = vector.broadcast %279 : vector<2x1xi32> to vector<2x384xi32>
    %281 = arith.cmpi eq, %18, %280 : vector<2x384xi32>
    %cst_90 = arith.constant 0x7F800000 : f32
    %282 = vector.broadcast %cst_90 : f32 to vector<2x384xf32>
    %283 = arith.select %281, %282, %266 : vector<2x384xi1>, vector<2x384xf32>
    %c5_i32_91 = arith.constant 5 : i32
    %284 = vector.broadcast %c5_i32_91 : i32 to vector<2x128xi32>
    %285 = arith.cmpi eq, %19, %284 : vector<2x128xi32>
    %286 = vector.shape_cast %273 : vector<2x1xf32> to vector<2x1xf32>
    %287 = vector.broadcast %286 : vector<2x1xf32> to vector<2x128xf32>
    %288 = arith.select %285, %287, %271 : vector<2x128xi1>, vector<2x128xf32>
    %cst_92 = arith.constant dense<0x7F800000> : vector<2xf32>
    %289 = vector.multi_reduction <minimumf>, %283, %cst_92 [1] : vector<2x384xf32> to vector<2xf32>
    %290 = vector.shape_cast %289 : vector<2xf32> to vector<2x1xf32>
    %291 = vector.broadcast %290 : vector<2x1xf32> to vector<2x384xf32>
    %292 = arith.cmpf oeq, %283, %291 : vector<2x384xf32>
    %c384_i32_93 = arith.constant 384 : i32
    %293 = vector.broadcast %c384_i32_93 : i32 to vector<2x384xi32>
    %294 = arith.select %292, %18, %293 : vector<2x384xi1>, vector<2x384xi32>
    %cst_94 = arith.constant dense<2147483647> : vector<2xi32>
    %295 = vector.multi_reduction <minsi>, %294, %cst_94 [1] : vector<2x384xi32> to vector<2xi32>
    %296 = vector.shape_cast %295 : vector<2xi32> to vector<2x1xi32>
    %297 = vector.broadcast %296 : vector<2x1xi32> to vector<2x384xi32>
    %298 = arith.cmpi eq, %18, %297 : vector<2x384xi32>
    %cst_95 = arith.constant 0x7F800000 : f32
    %299 = vector.broadcast %cst_95 : f32 to vector<2x384xf32>
    %300 = arith.select %298, %299, %283 : vector<2x384xi1>, vector<2x384xf32>
    %c6_i32_96 = arith.constant 6 : i32
    %301 = vector.broadcast %c6_i32_96 : i32 to vector<2x128xi32>
    %302 = arith.cmpi eq, %19, %301 : vector<2x128xi32>
    %303 = vector.shape_cast %290 : vector<2x1xf32> to vector<2x1xf32>
    %304 = vector.broadcast %303 : vector<2x1xf32> to vector<2x128xf32>
    %305 = arith.select %302, %304, %288 : vector<2x128xi1>, vector<2x128xf32>
    %cst_97 = arith.constant dense<0x7F800000> : vector<2xf32>
    %306 = vector.multi_reduction <minimumf>, %300, %cst_97 [1] : vector<2x384xf32> to vector<2xf32>
    %307 = vector.shape_cast %306 : vector<2xf32> to vector<2x1xf32>
    %308 = vector.broadcast %307 : vector<2x1xf32> to vector<2x384xf32>
    %309 = arith.cmpf oeq, %300, %308 : vector<2x384xf32>
    %c384_i32_98 = arith.constant 384 : i32
    %310 = vector.broadcast %c384_i32_98 : i32 to vector<2x384xi32>
    %311 = arith.select %309, %18, %310 : vector<2x384xi1>, vector<2x384xi32>
    %cst_99 = arith.constant dense<2147483647> : vector<2xi32>
    %312 = vector.multi_reduction <minsi>, %311, %cst_99 [1] : vector<2x384xi32> to vector<2xi32>
    %313 = vector.shape_cast %312 : vector<2xi32> to vector<2x1xi32>
    %314 = vector.broadcast %313 : vector<2x1xi32> to vector<2x384xi32>
    %315 = arith.cmpi eq, %18, %314 : vector<2x384xi32>
    %cst_100 = arith.constant 0x7F800000 : f32
    %316 = vector.broadcast %cst_100 : f32 to vector<2x384xf32>
    %317 = arith.select %315, %316, %300 : vector<2x384xi1>, vector<2x384xf32>
    %c7_i32_101 = arith.constant 7 : i32
    %318 = vector.broadcast %c7_i32_101 : i32 to vector<2x128xi32>
    %319 = arith.cmpi eq, %19, %318 : vector<2x128xi32>
    %320 = vector.shape_cast %307 : vector<2x1xf32> to vector<2x1xf32>
    %321 = vector.broadcast %320 : vector<2x1xf32> to vector<2x128xf32>
    %322 = arith.select %319, %321, %305 : vector<2x128xi1>, vector<2x128xf32>
    %cst_102 = arith.constant dense<0x7F800000> : vector<2xf32>
    %323 = vector.multi_reduction <minimumf>, %317, %cst_102 [1] : vector<2x384xf32> to vector<2xf32>
    %324 = vector.shape_cast %323 : vector<2xf32> to vector<2x1xf32>
    %325 = vector.broadcast %324 : vector<2x1xf32> to vector<2x384xf32>
    %326 = arith.cmpf oeq, %317, %325 : vector<2x384xf32>
    %c384_i32_103 = arith.constant 384 : i32
    %327 = vector.broadcast %c384_i32_103 : i32 to vector<2x384xi32>
    %328 = arith.select %326, %18, %327 : vector<2x384xi1>, vector<2x384xi32>
    %cst_104 = arith.constant dense<2147483647> : vector<2xi32>
    %329 = vector.multi_reduction <minsi>, %328, %cst_104 [1] : vector<2x384xi32> to vector<2xi32>
    %330 = vector.shape_cast %329 : vector<2xi32> to vector<2x1xi32>
    %331 = vector.broadcast %330 : vector<2x1xi32> to vector<2x384xi32>
    %332 = arith.cmpi eq, %18, %331 : vector<2x384xi32>
    %cst_105 = arith.constant 0x7F800000 : f32
    %333 = vector.broadcast %cst_105 : f32 to vector<2x384xf32>
    %334 = arith.select %332, %333, %317 : vector<2x384xi1>, vector<2x384xf32>
    %c8_i32_106 = arith.constant 8 : i32
    %335 = vector.broadcast %c8_i32_106 : i32 to vector<2x128xi32>
    %336 = arith.cmpi eq, %19, %335 : vector<2x128xi32>
    %337 = vector.shape_cast %324 : vector<2x1xf32> to vector<2x1xf32>
    %338 = vector.broadcast %337 : vector<2x1xf32> to vector<2x128xf32>
    %339 = arith.select %336, %338, %322 : vector<2x128xi1>, vector<2x128xf32>
    %cst_107 = arith.constant dense<0x7F800000> : vector<2xf32>
    %340 = vector.multi_reduction <minimumf>, %334, %cst_107 [1] : vector<2x384xf32> to vector<2xf32>
    %341 = vector.shape_cast %340 : vector<2xf32> to vector<2x1xf32>
    %c9_i32_108 = arith.constant 9 : i32
    %342 = vector.broadcast %c9_i32_108 : i32 to vector<2x128xi32>
    %343 = arith.cmpi eq, %19, %342 : vector<2x128xi32>
    %344 = vector.shape_cast %341 : vector<2x1xf32> to vector<2x1xf32>
    %345 = vector.broadcast %344 : vector<2x1xf32> to vector<2x128xf32>
    %346 = arith.select %343, %345, %339 : vector<2x128xi1>, vector<2x128xf32>
    %c0_109 = arith.constant 0 : index
    %c0_110 = arith.constant 0 : index
    %347 = vector.load %arg11[%c0_109, %c0_110] : memref<2x128xf32, #tpu.memory_space<vmem>>, vector<2x128xf32>
    tpu.vector_store %arg11[%c0_109, %c0_110], %346 {strides = array<i32>} : memref<2x128xf32, #tpu.memory_space<vmem>>, vector<2x128xf32>,
    %c1_i32_111 = arith.constant 1 : i32
    %348 = arith.cmpi eq, %arg1, %c1_i32_111 : i32
    %349 = arith.extui %348 : i1 to i32
    %c0_i32_112 = arith.constant 0 : i32
    %350 = arith.cmpi ne, %349, %c0_i32_112 : i32
    scf.if %350 {
      %c10_i32 = arith.constant 10 : i32
      %351 = vector.broadcast %c10_i32 : i32 to vector<2x128xi32>
      %352 = arith.cmpi slt, %19, %351 : vector<2x128xi32>
      %c0_113 = arith.constant 0 : index
      %c0_114 = arith.constant 0 : index
      %353 = vector.load %arg10[%c0_113, %c0_114] : memref<2x128xf32, #tpu.memory_space<vmem>>, vector<2x128xf32>
      %cst_115 = arith.constant 0.000000e+00 : f32
      %354 = vector.broadcast %cst_115 : f32 to vector<2x128xf32>
      %355 = arith.select %352, %353, %354 : vector<2x128xi1>, vector<2x128xf32>
      %c10_i32_116 = arith.constant 10 : i32
      %356 = vector.broadcast %c10_i32_116 : i32 to vector<2x128xi32>
      %357 = arith.cmpi slt, %19, %356 : vector<2x128xi32>
      %c0_117 = arith.constant 0 : index
      %c0_118 = arith.constant 0 : index
      %358 = vector.load %arg11[%c0_117, %c0_118] : memref<2x128xf32, #tpu.memory_space<vmem>>, vector<2x128xf32>
      %cst_119 = arith.constant 0.000000e+00 : f32
      %359 = vector.broadcast %cst_119 : f32 to vector<2x128xf32>
      %360 = arith.select %357, %358, %359 : vector<2x128xi1>, vector<2x128xf32>
      %c0_120 = arith.constant 0 : index
      %c0_121 = arith.constant 0 : index
      %361 = vector.load %arg4[%c0_120, %c0_121] : memref<1x128xf32, #tpu.memory_space<vmem>>, vector<1x128xf32>
      %362 = vector.broadcast %361 : vector<1x128xf32> to vector<2x128xf32>
      %363 = arith.mulf %355, %362 : vector<2x128xf32>
      %cst_122 = arith.constant dense<0.000000e+00> : vector<2xf32>
      %364 = vector.multi_reduction <add>, %363, %cst_122 [1] : vector<2x128xf32> to vector<2xf32>
      %365 = vector.shape_cast %364 : vector<2xf32> to vector<2x1xf32>
      %c0_123 = arith.constant 0 : index
      %c0_124 = arith.constant 0 : index
      %366 = vector.load %arg5[%c0_123, %c0_124] : memref<1x128xf32, #tpu.memory_space<vmem>>, vector<1x128xf32>
      %367 = vector.broadcast %366 : vector<1x128xf32> to vector<2x128xf32>
      %368 = arith.mulf %360, %367 : vector<2x128xf32>
      %cst_125 = arith.constant dense<0.000000e+00> : vector<2xf32>
      %369 = vector.multi_reduction <add>, %368, %cst_125 [1] : vector<2x128xf32> to vector<2xf32>
      %370 = vector.shape_cast %369 : vector<2xf32> to vector<2x1xf32>
      %371 = arith.addf %365, %370 : vector<2x1xf32>
      %c0_126 = arith.constant 0 : index
      %372 = memref.load %arg7[%c0_126] : memref<1xf32, #tpu.memory_space<smem>>
      %373 = vector.broadcast %372 : f32 to vector<2x1xf32>
      %374 = arith.addf %371, %373 : vector<2x1xf32>
      %c0_127 = arith.constant 0 : index
      %c0_128 = arith.constant 0 : index
      %375 = vector.load %arg8[%c0_127, %c0_128] : memref<2x1xf32, #tpu.memory_space<vmem>>, vector<2x1xf32>
      tpu.vector_store %arg8[%c0_127, %c0_128], %374 {strides = array<i32>} : memref<2x1xf32, #tpu.memory_space<vmem>>, vector<2x1xf32>,
    } else {
    }
    return
  }
  func.func @transform_0(%arg0: i32, %arg1: i32) -> (i32, i32, i32) {
    %c0_i32 = arith.constant 0 : i32
    %c0_i32_0 = arith.constant 0 : i32
    return %arg0, %arg1, %c0_i32 : i32, i32, i32
  }
  func.func @transform_1(%arg0: i32, %arg1: i32) -> (i32, i32) {
    %c0_i32 = arith.constant 0 : i32
    %c0_i32_0 = arith.constant 0 : i32
    %c0_i32_1 = arith.constant 0 : i32
    return %c0_i32, %c0_i32_0 : i32, i32
  }
  func.func @transform_2(%arg0: i32, %arg1: i32) -> (i32, i32) {
    %c0_i32 = arith.constant 0 : i32
    %c0_i32_0 = arith.constant 0 : i32
    %c0_i32_1 = arith.constant 0 : i32
    return %c0_i32, %c0_i32_0 : i32, i32
  }
  func.func @transform_3(%arg0: i32, %arg1: i32) -> (i32, i32) {
    %c0_i32 = arith.constant 0 : i32
    %c0_i32_0 = arith.constant 0 : i32
    %c0_i32_1 = arith.constant 0 : i32
    return %c0_i32, %c0_i32_0 : i32, i32
  }
  func.func @transform_4(%arg0: i32, %arg1: i32) -> i32 {
    %c0_i32 = arith.constant 0 : i32
    %c0_i32_0 = arith.constant 0 : i32
    return %c0_i32 : i32
  }
  func.func @transform_5(%arg0: i32, %arg1: i32) -> i32 {
    %c0_i32 = arith.constant 0 : i32
    %c0_i32_0 = arith.constant 0 : i32
    return %c0_i32 : i32
  }
  func.func @transform_6(%arg0: i32, %arg1: i32) -> (i32, i32) {
    %c0_i32 = arith.constant 0 : i32
    %c0_i32_0 = arith.constant 0 : i32
    return %arg0, %c0_i32 : i32, i32
  }
  func.func @transform_7(%arg0: i32, %arg1: i32) -> (i32, i32) {
    %c0_i32 = arith.constant 0 : i32
    return %arg0, %arg1 : i32, i32
  }
}

</mosaic_0001>

<bundles_post_ra>
// kernel: tpu_custom_call.1
= control target key start
LH: loop header
LB: loop body
LE: loop exit
PB: predicated region body
PF: predicated region fallthrough
CT: control target
= control target key end

     0   :  { %s2865_s0 = inlined_call_operand.hbm [shape: f32[2,512,256], index: 0, kind: input, shape index: {}]   ;;  %s2866_s1 = inlined_call_operand.vmem [shape: f32[1,256], index: 1, kind: input, shape index: {}]   ;;  %s2867_s2 = inlined_call_operand.vmem [shape: f32[1,128], index: 2, kind: input, shape index: {}]   ;;  %s2868_s3 = inlined_call_operand.vmem [shape: f32[1,128], index: 3, kind: input, shape index: {}]   ;;  %s2869_s4 = inlined_call_operand.<no memory space> [shape: f32[1], index: 4, kind: input, shape index: {}]   ;;  %s2870_s5 = inlined_call_operand.<no memory space> [shape: f32[1], index: 5, kind: input, shape index: {}]   ;;  %s2871_s6 = inlined_call_operand.vmem [shape: f32[2,1], index: 6, kind: output, shape index: {0}]   ;;  %s2872_s7 = inlined_call_operand.hbm [shape: f32[2,512], index: 7, kind: output, shape index: {1}]  }
   0x1   :  { %13 = sst [smem:[#allocation4]] %s2869_s4 }
   0x2   :  { %14 = sst [smem:[#allocation5]] %s2870_s5 }
   0x3   :  { %15 = vsyncpa [#allocation7], 0 }
   0x4   :  { %17 = vsyncpa [#allocation7 + $0x1], 0 }
   0x5   :  { %18 = vsyncpa [#allocation8], 0 }
   0x6   :  { %20 = vsyncpa [#allocation8 + $0x1], 0  ;;  %s1946_s28 = smov 0   ;;  %s1948_s29 = smov 0  }
   0x7   :  { %s1950_s30 = smov 0   ;;  %s1952_s8 = smov 0  }
   0x8   :  { %s1954_s9 = smov 0   ;;  %s1956_s10 = smov 0  }
   0x9 LB: > { %s1643_s4 = sadd.s32 4294967295, %s1888_s10   ;;  %s1644_s5 = sadd.s32 4294967294, %s1888_s10   ;;  %s1888_s10 = sphi %s1956_s10, %s26_s10   ;;  %s1884_s9 = sphi %s1954_s9, %s2886_s9   ;;  %s1880_s8 = sphi %s1952_s8, %s2885_s8   ;;  %s1876_s30 = sphi %s1950_s30, %s2884_s30   ;;  %s1872_s29 = sphi %s1948_s29, %s2883_s29   ;;  %s1868_s28 = sphi %s1946_s28, %s2882_s28  }
   0xa   : > { %s35_s11 = sadd.s32 1, %s1884_s9  ;;  %s47_s12 = sadd.s32 1, %s1876_s30 }
   0xb   : > { %p36_p0 = scmp.ge.s32.totalorder %s35_s11, 2  ;;  %p54_p1 = scmp.ne.s32.totalorder %s1876_s30, %s1872_s29 }
   0xc   : > { %p55_p2 = scmp.eq.s32.totalorder %s1888_s10, 0  ;;  %p60_p3 = scmp.ne.s32.totalorder %s1872_s29, %s1868_s28 }
   0xd   : > { %s2888_s11 = smov (%p36_p0, %s35_s11), 0  ;;  %p61_p5 = scmp.eq.s32.totalorder %s1643_s4, 0 }
   0xe   : > { %2875 = sst [smem:[#allocation15_spill]] %s2888_s11  ;;  %p1987_p4 = por %p55_p2, %p54_p1 }
   0xf   : > { %s43_s14 = ssub.s32 %s1884_s9, %s2888_s11  ;;  %p217_p6 = scmp.eq.s32.totalorder %s1643_s4, 1 }
  0x10   : > { %p45_p7 = scmp.eq.s32.totalorder %s43_s14, 0  ;;  %p1993_p8 = por %p61_p5, %p60_p3 }
  0x11   : > { %p1997_p9 = por %p217_p6, %p54_p1  ;;  %p223_p10 = scmp.eq.s32.totalorder %s1644_s5, 1 }
  0x12   : > { %s2002_s17 = scalar_select %p45_p7, %s1876_s30, %s47_s12  }
  0x13   : > { %p2004_p11 = por %p223_p10, %p60_p3  ;;  %p2874_p12 = scmp.ge.s32.totalorder %s1888_s10, 2 }
  0x15   : > { %254 = sbr.rel (%p2874_p12) target bundleno = 39 (0x27), region = 36 }
  0x1a   : > { %s258_s19 = sand.u32 1, %s1876_s30   ;;  %s1733_s20 = sshll.u32 %s1884_s9, 13 }
  0x1b   : > { %s1647_s21 = sshll.u32 %s258_s19, 10  ;;  %s272_s24 = scalar_lea.hbm %s2865_s0, %s1733_s20 }
  0x1c   : > { %s1735_s25 = scalar_select %p1987_p4, [#allocation0], [#allocation12] }
  0x1d   : > { %s262_s26 = scalar_lea.vmem [#allocation6], %s1647_s21  ;;  %s1890_s5 = smov 16384  }
  0x1e   : > { %s285_s27 = sshll.u32 %s262_s26, 4  ;;  %s277_s4 = sld [smem:[%s1735_s25]]   ;;  %s286_s27 = int_to_ptr.vmem [resolvable:$true] %s285_s27 }
  0x1f   : > { %1736 = sst [smem:[#allocation11]] (%p1987_p4), %s1890_s5  ;;  %s1891_s12 = smov 8192  }
  0x20   : > { %1737 = sst [smem:[#allocation11 + $0x1]] (%p1987_p4), %s1891_s12  ;;  %s1892_s14 = smov 32  }
  0x21   : > { %1738 = sst [smem:[#allocation11 + $0x2]] (%p1987_p4), %s1892_s14  ;;  %s1893_s11 = smov 256  }
  0x22   : > { %1739 = sst [smem:[#allocation11 + $0x3]] (%p1987_p4), %s1893_s11  ;;  %s1894_s21 = smov 16  }
  0x23   : > { %1740 = sst [smem:[#allocation11 + $0x4]] (%p1987_p4), %s1893_s11  ;;  %s259_s23 = scalar_lea.sflag [#allocation7], %s258_s19 }
  0x24   : > { %s1651_s20 = sshll.u32 %s277_s4, 26  ;;  %1741 = sst [smem:[#allocation11 + $0x5]] (%p1987_p4), %s1894_s21 }
  0x25   : > { %s1652_s22 = sadd.s32 134217728, %s1651_s20  ;;  %s1895_s25 = smov 131072  }
  0x26   : > { %1742 = dma.general (%p1987_p4), %s272_s24, 16384, %s286_s27, %s259_s23, %s1895_s25, [#allocation11], %s1652_s22, 0  }
  0x27 PF: > { %p1653_p13 = scmp.ge.s32.totalorder %s1888_s10, 1  ;;  %p306_p0 = scmp.lt.s32.totalorder %s1888_s10, 3 }
  0x29   : > { %p307_p1 = pnand %p1653_p13, %p306_p0 }
  0x2a   : > { %s2035_s26 = sand.u32 (!%p307_p1), 1, %s1872_s29  }
  0x2b   : > { %310 = sbr.rel (%p307_p1) target bundleno = 4660 (0x1234), region = 44  ;;  %s1654_s11 = sshll.u32 (!%p307_p1), %s2035_s26, 10 }
  0x2c   : > { %s313_s4 = scalar_lea.sflag (!%p307_p1), [#allocation7], %s2035_s26  ;;  %s2039_s5 = scalar_lea.vmem (!%p307_p1), [#allocation6], %s1654_s11 }
  0x30   : > { %1859 = dma.done.wait (%p1993_p8), %s313_s4, 16384  }
  0x31   : > { %1861 = vsyncadd (%p1993_p8), %s313_s4, 4294950912  ;;  %v391_v0 = vld [vmem:[%s2039_s5 + $0xf8] sm:$0xff]  ;;  %v390_v2 = vld [vmem:[%s2039_s5 + $0xf0] sm:$0xff]  ;;  %v426_v36 = vlaneseq  ;;  %s359_s19 = sld [smem:[#allocation4]]  ;;  %s1655_s24 = sshll.u32 %s2035_s26, 2 }
  0x32   : > { %v1687_v1 = vld [vmem:[%s2039_s5 + $0x2f8] sm:$0xff]  ;;  %436 = vmatprep.subr.mxu0 %v391_v0  ;;  %v1686_v3 = vld [vmem:[%s2039_s5 + $0x2f0] sm:$0xff]  ;;  %v389_v4 = vld [vmem:[%s2039_s5 + $0xe8] sm:$0xff]  ;;  %s2188_s27 = scalar_lea.vmem [#allocation9], %s1655_s24  ;;  %p1721_p2 = scmp.ne.s32.totalorder %s1880_s8, 0 }
  0x33   : > { %595 = vmatprep.subr.mxu1 %v1687_v1  ;;  %v1685_v5 = vld [vmem:[%s2039_s5 + $0x2e8] sm:$0xff]  ;;  %437 = vmatpush1.xpose.msra.mxu0 %v390_v2  ;;  %v388_v6 = vld [vmem:[%s2039_s5 + $0xe0] sm:$0xff]  ;;  %v387_v8 = vld [vmem:[%s2039_s5 + $0xd8] sm:$0xff]  ;;  %v2086_v41 = vshrl.u32 %v426_v36, 7  ;;  %vm527_vm0 = vcmp.lt.s32.totalorder %v426_v36, 256 }
  0x34   : > { %596 = vmatpush1.xpose.msra.mxu1 %v1686_v3  ;;  %438 = vmatprep.subr.mxu0 %v389_v4  ;;  %v1684_v7 = vld [vmem:[%s2039_s5 + $0x2e0] sm:$0xff]  ;;  %v1683_v9 = vld [vmem:[%s2039_s5 + $0x2d8] sm:$0xff]  ;;  %v386_v10 = vld [vmem:[%s2039_s5 + $0xd0] sm:$0xff] }
  0x35   : > { %597 = vmatprep.subr.mxu1 %v1685_v5  ;;  %v1682_v11 = vld [vmem:[%s2039_s5 + $0x2d0] sm:$0xff]  ;;  %v385_v12 = vld [vmem:[%s2039_s5 + $0xc8] sm:$0xff]  ;;  %v384_v14 = vld [vmem:[%s2039_s5 + $0xc0] sm:$0xff]  ;;  %v432_v46 = vsub.s32 1, %v2086_v41 }
  0x36   : > { %v1681_v13 = vld [vmem:[%s2039_s5 + $0x2c8] sm:$0xff]  ;;  %v1680_v15 = vld [vmem:[%s2039_s5 + $0x2c0] sm:$0xff]  ;;  %v383_v16 = vld [vmem:[%s2039_s5 + $0xb8] sm:$0xff] }
  0x37   : > { %439 = vmatpush1.xpose.msra.mxu0 %v388_v6  ;;  %v1679_v17 = vld [vmem:[%s2039_s5 + $0x2b8] sm:$0xff]  ;;  %v382_v18 = vld [vmem:[%s2039_s5 + $0xb0] sm:$0xff]  ;;  %v381_v20 = vld [vmem:[%s2039_s5 + $0xa8] sm:$0xff] }
  0x38   : > { %598 = vmatpush1.xpose.msra.mxu1 %v1684_v7  ;;  %440 = vmatprep.subr.mxu0 %v387_v8  ;;  %v1678_v19 = vld [vmem:[%s2039_s5 + $0x2b0] sm:$0xff]  ;;  %v1677_v21 = vld [vmem:[%s2039_s5 + $0x2a8] sm:$0xff]  ;;  %v380_v22 = vld [vmem:[%s2039_s5 + $0xa0] sm:$0xff] }
  0x39   : > { %599 = vmatprep.subr.mxu1 %v1683_v9  ;;  %v1676_v23 = vld [vmem:[%s2039_s5 + $0x2a0] sm:$0xff]  ;;  %v379_v24 = vld [vmem:[%s2039_s5 + $0x98] sm:$0xff]  ;;  %v378_v26 = vld [vmem:[%s2039_s5 + $0x90] sm:$0xff] }
  0x3a   : > { %v1675_v25 = vld [vmem:[%s2039_s5 + $0x298] sm:$0xff]  ;;  %v1674_v27 = vld [vmem:[%s2039_s5 + $0x290] sm:$0xff]  ;;  %v377_v28 = vld [vmem:[%s2039_s5 + $0x88] sm:$0xff] }
  0x3b   : > { %441 = vmatpush1.xpose.msra.mxu0 %v386_v10  ;;  %v1673_v29 = vld [vmem:[%s2039_s5 + $0x288] sm:$0xff]  ;;  %v376_v30 = vld [vmem:[%s2039_s5 + $0x80] sm:$0xff]  ;;  %v375_v32 = vld [vmem:[%s2039_s5 + $0x78] sm:$0xff] }
  0x3c   : > { %600 = vmatpush1.xpose.msra.mxu1 %v1682_v11  ;;  %442 = vmatprep.subr.mxu0 %v385_v12  ;;  %v1672_v31 = vld [vmem:[%s2039_s5 + $0x280] sm:$0xff]  ;;  %v1671_v33 = vld [vmem:[%s2039_s5 + $0x278] sm:$0xff]  ;;  %v374_v34 = vld [vmem:[%s2039_s5 + $0x70] sm:$0xff] }
  0x3d   : > { %601 = vmatprep.subr.mxu1 %v1681_v13  ;;  %v1670_v35 = vld [vmem:[%s2039_s5 + $0x270] sm:$0xff]  ;;  %v373_v37 = vld [vmem:[%s2039_s5 + $0x68] sm:$0xff]  ;;  %v372_v39 = vld [vmem:[%s2039_s5 + $0x60] sm:$0xff] }
  0x3e   : > { %v1669_v38 = vld [vmem:[%s2039_s5 + $0x268] sm:$0xff]  ;;  %v1668_v40 = vld [vmem:[%s2039_s5 + $0x260] sm:$0xff]  ;;  %v371_v42 = vld [vmem:[%s2039_s5 + $0x58] sm:$0xff] }
  0x3f   : > { %443 = vmatpush1.xpose.msra.mxu0 %v384_v14  ;;  %v1667_v43 = vld [vmem:[%s2039_s5 + $0x258] sm:$0xff]  ;;  %v370_v44 = vld [vmem:[%s2039_s5 + $0x50] sm:$0xff]  ;;  %v369_v47 = vld [vmem:[%s2039_s5 + $0x48] sm:$0xff] }
  0x40   : > { %602 = vmatpush1.xpose.msra.mxu1 %v1680_v15  ;;  %444 = vmatprep.subr.mxu0 %v383_v16  ;;  %v1666_v45 = vld [vmem:[%s2039_s5 + $0x250] sm:$0xff]  ;;  %v1665_v48 = vld [vmem:[%s2039_s5 + $0x248] sm:$0xff]  ;;  %v2098_v49 = vld [vmem:[%s2866_s1] sm:$0x3] }
  0x41   : > { %603 = vmatprep.subr.mxu1 %v1679_v17  ;;  %v368_v50 = vld [vmem:[%s2039_s5 + $0x40] sm:$0xff]  ;;  %v433_v52 = vrot.slane %v2098_v49, %v432_v46  ;;  %v367_v53 = vld [vmem:[%s2039_s5 + $0x38] sm:$0xff]  ;;  %v366_v55 = vld [vmem:[%s2039_s5 + $0x30] sm:$0xff] }
  0x42   : > { %v1664_v51 = vld [vmem:[%s2039_s5 + $0x240] sm:$0xff]  ;;  %v1663_v54 = vld [vmem:[%s2039_s5 + $0x238] sm:$0xff]  ;;  %v1662_v56 = vld [vmem:[%s2039_s5 + $0x230] sm:$0xff] }
  0x43   : > { %445 = vmatpush1.xpose.msra.mxu0 %v382_v18  ;;  %500 = vmatprep.mubr.f32.mxu0 %v433_v52  ;;  %v365_v57 = vld [vmem:[%s2039_s5 + $0x28] sm:$0xff]  ;;  %v364_v59 = vld [vmem:[%s2039_s5 + $0x20] sm:$0xff]  ;;  %v363_v61 = vld [vmem:[%s2039_s5 + $0x18] sm:$0xff] }
  0x44   : > { %604 = vmatpush1.xpose.msra.mxu1 %v1678_v19  ;;  %446 = vmatprep.subr.mxu0 %v381_v20  ;;  %v1661_v58 = vld [vmem:[%s2039_s5 + $0x228] sm:$0xff]  ;;  %v1660_v60 = vld [vmem:[%s2039_s5 + $0x220] sm:$0xff]  ;;  %v1659_v62 = vld [vmem:[%s2039_s5 + $0x218] sm:$0xff] }
  0x45   : > { %605 = vmatprep.subr.mxu1 %v1677_v21  ;;  %659 = vmatprep.mubr.f32.mxu1 %v433_v52  ;;  %v362_v63 = vld [vmem:[%s2039_s5 + $0x10] sm:$0xff]  ;;  %v361_v1 = vld [vmem:[%s2039_s5 + $0x8] sm:$0xff]  ;;  %v360_v3 = vld [vmem:[%s2039_s5] sm:$0xff] }
  0x46   : > { %v1658_v0 = vld [vmem:[%s2039_s5 + $0x210] sm:$0xff]  ;;  %v1657_v2 = vld [vmem:[%s2039_s5 + $0x208] sm:$0xff]  ;;  %v1656_v4 = vld [vmem:[%s2039_s5 + $0x200] sm:$0xff] }
  0x47   : > { %447 = vmatpush1.xpose.msra.mxu0 %v380_v22  ;;  %v423_v5 = vld [vmem:[%s2039_s5 + $0x1f8] sm:$0xff]  ;;  %v422_v7 = vld [vmem:[%s2039_s5 + $0x1f0] sm:$0xff]  ;;  %v421_v9 = vld [vmem:[%s2039_s5 + $0x1e8] sm:$0xff] }
  0x48   : > { %606 = vmatpush1.xpose.msra.mxu1 %v1676_v23  ;;  %448 = vmatprep.subr.mxu0 %v379_v24  ;;  %v1719_v6 = vld [vmem:[%s2039_s5 + $0x3f8] sm:$0xff]  ;;  %v1718_v8 = vld [vmem:[%s2039_s5 + $0x3f0] sm:$0xff]  ;;  %v1717_v10 = vld [vmem:[%s2039_s5 + $0x3e8] sm:$0xff] }
  0x49   : > { %607 = vmatprep.subr.mxu1 %v1675_v25  ;;  %v420_v11 = vld [vmem:[%s2039_s5 + $0x1e0] sm:$0xff]  ;;  %v419_v13 = vld [vmem:[%s2039_s5 + $0x1d8] sm:$0xff]  ;;  %v418_v15 = vld [vmem:[%s2039_s5 + $0x1d0] sm:$0xff] }
  0x4a   : > { %v1716_v12 = vld [vmem:[%s2039_s5 + $0x3e0] sm:$0xff]  ;;  %v1715_v14 = vld [vmem:[%s2039_s5 + $0x3d8] sm:$0xff]  ;;  %v1714_v16 = vld [vmem:[%s2039_s5 + $0x3d0] sm:$0xff] }
  0x4b   : > { %449 = vmatpush1.xpose.msra.mxu0 %v378_v26  ;;  %v417_v17 = vld [vmem:[%s2039_s5 + $0x1c8] sm:$0xff]  ;;  %v416_v19 = vld [vmem:[%s2039_s5 + $0x1c0] sm:$0xff]  ;;  %v415_v21 = vld [vmem:[%s2039_s5 + $0x1b8] sm:$0xff] }
  0x4c   : > { %608 = vmatpush1.xpose.msra.mxu1 %v1674_v27  ;;  %450 = vmatprep.subr.mxu0 %v377_v28  ;;  %v1713_v18 = vld [vmem:[%s2039_s5 + $0x3c8] sm:$0xff]  ;;  %v1712_v20 = vld [vmem:[%s2039_s5 + $0x3c0] sm:$0xff]  ;;  %v1711_v22 = vld [vmem:[%s2039_s5 + $0x3b8] sm:$0xff] }
  0x4d   : > { %609 = vmatprep.subr.mxu1 %v1673_v29  ;;  %v414_v23 = vld [vmem:[%s2039_s5 + $0x1b0] sm:$0xff]  ;;  %v413_v25 = vld [vmem:[%s2039_s5 + $0x1a8] sm:$0xff]  ;;  %v412_v27 = vld [vmem:[%s2039_s5 + $0x1a0] sm:$0xff] }
  0x4e   : > { %v1710_v24 = vld [vmem:[%s2039_s5 + $0x3b0] sm:$0xff]  ;;  %v1709_v26 = vld [vmem:[%s2039_s5 + $0x3a8] sm:$0xff]  ;;  %v1708_v28 = vld [vmem:[%s2039_s5 + $0x3a0] sm:$0xff] }
  0x4f   : > { %451 = vmatpush1.xpose.msra.mxu0 %v376_v30  ;;  %v411_v29 = vld [vmem:[%s2039_s5 + $0x198] sm:$0xff]  ;;  %v1700_v46 = vld [vmem:[%s2039_s5 + $0x360] sm:$0xff]  ;;  %v401_v52 = vld [vmem:[%s2039_s5 + $0x148] sm:$0xff] }
  0x50   : > { %610 = vmatpush1.xpose.msra.mxu1 %v1672_v31  ;;  %452 = vmatprep.subr.mxu0 %v375_v32  ;;  %v1707_v30 = vld [vmem:[%s2039_s5 + $0x398] sm:$0xff]  ;;  %v410_v31 = vld [vmem:[%s2039_s5 + $0x190] sm:$0xff] }
  0x51   : > { %611 = vmatprep.subr.mxu1 %v1671_v33  ;;  %v1706_v32 = vld [vmem:[%s2039_s5 + $0x390] sm:$0xff]  ;;  %v409_v33 = vld [vmem:[%s2039_s5 + $0x188] sm:$0xff] }
  0x53   : > { %453 = vmatpush1.xpose.msra.mxu0 %v374_v34  ;;  %v1705_v34 = vld [vmem:[%s2039_s5 + $0x388] sm:$0xff] }
  0x54   : > { %612 = vmatpush1.xpose.msra.mxu1 %v1670_v35  ;;  %454 = vmatprep.subr.mxu0 %v373_v37  ;;  %v408_v35 = vld [vmem:[%s2039_s5 + $0x180] sm:$0xff] }
  0x55   : > { %613 = vmatprep.subr.mxu1 %v1669_v38  ;;  %v1704_v37 = vld [vmem:[%s2039_s5 + $0x380] sm:$0xff]  ;;  %v407_v38 = vld [vmem:[%s2039_s5 + $0x178] sm:$0xff] }
  0x57   : > { %455 = vmatpush1.xpose.msra.mxu0 %v372_v39  ;;  %v1703_v39 = vld [vmem:[%s2039_s5 + $0x378] sm:$0xff] }
  0x58   : > { %614 = vmatpush1.xpose.msra.mxu1 %v1668_v40  ;;  %456 = vmatprep.subr.mxu0 %v371_v42  ;;  %v406_v40 = vld [vmem:[%s2039_s5 + $0x170] sm:$0xff] }
  0x59   : > { %615 = vmatprep.subr.mxu1 %v1667_v43  ;;  %v1702_v42 = vld [vmem:[%s2039_s5 + $0x370] sm:$0xff]  ;;  %v405_v43 = vld [vmem:[%s2039_s5 + $0x168] sm:$0xff] }
  0x5b   : > { %457 = vmatpush1.xpose.msra.mxu0 %v370_v44  ;;  %v1701_v44 = vld [vmem:[%s2039_s5 + $0x368] sm:$0xff] }
  0x5c   : > { %616 = vmatpush1.xpose.msra.mxu1 %v1666_v45  ;;  %458 = vmatprep.subr.mxu0 %v369_v47  ;;  %v404_v45 = vld [vmem:[%s2039_s5 + $0x160] sm:$0xff]  ;;  %v403_v47 = vld [vmem:[%s2039_s5 + $0x158] sm:$0xff] }
  0x5d   : > { %617 = vmatprep.subr.mxu1 %v1665_v48  ;;  %v1699_v48 = vld [vmem:[%s2039_s5 + $0x358] sm:$0xff] }
  0x5f   : > { %459 = vmatpush1.xpose.msra.mxu0 %v368_v50  ;;  %v402_v50 = vld [vmem:[%s2039_s5 + $0x150] sm:$0xff] }
  0x60   : > { %618 = vmatpush1.xpose.msra.mxu1 %v1664_v51  ;;  %460 = vmatprep.subr.mxu0 %v367_v53  ;;  %v1698_v51 = vld [vmem:[%s2039_s5 + $0x350] sm:$0xff]  ;;  %v1697_v53 = vld [vmem:[%s2039_s5 + $0x348] sm:$0xff] }
  0x61   : > { %619 = vmatprep.subr.mxu1 %v1663_v54  ;;  %v400_v54 = vld [vmem:[%s2039_s5 + $0x140] sm:$0xff] }
  0x63   : > { %461 = vmatpush1.xpose.msra.mxu0 %v366_v55  ;;  %v1696_v55 = vld [vmem:[%s2039_s5 + $0x340] sm:$0xff] }
  0x64   : > { %620 = vmatpush1.xpose.msra.mxu1 %v1662_v56  ;;  %462 = vmatprep.subr.mxu0 %v365_v57  ;;  %v399_v56 = vld [vmem:[%s2039_s5 + $0x138] sm:$0xff] }
  0x65   : > { %621 = vmatprep.subr.mxu1 %v1661_v58  ;;  %v1695_v57 = vld [vmem:[%s2039_s5 + $0x338] sm:$0xff]  ;;  %v398_v58 = vld [vmem:[%s2039_s5 + $0x130] sm:$0xff] }
  0x67   : > { %463 = vmatpush1.xpose.msra.mxu0 %v364_v59  ;;  %v1694_v59 = vld [vmem:[%s2039_s5 + $0x330] sm:$0xff] }
  0x68   : > { %622 = vmatpush1.xpose.msra.mxu1 %v1660_v60  ;;  %464 = vmatprep.subr.mxu0 %v363_v61  ;;  %v397_v60 = vld [vmem:[%s2039_s5 + $0x128] sm:$0xff] }
  0x69   : > { %623 = vmatprep.subr.mxu1 %v1659_v62  ;;  %v1693_v61 = vld [vmem:[%s2039_s5 + $0x328] sm:$0xff]  ;;  %v396_v62 = vld [vmem:[%s2039_s5 + $0x120] sm:$0xff] }
  0x6b   : > { %465 = vmatpush1.xpose.msra.mxu0 %v362_v63  ;;  %v1692_v63 = vld [vmem:[%s2039_s5 + $0x320] sm:$0xff] }
  0x6c   : > { %624 = vmatpush1.xpose.msra.mxu1 %v1658_v0  ;;  %466 = vmatprep.subr.mxu0 %v361_v1  ;;  %v395_v0 = vld [vmem:[%s2039_s5 + $0x118] sm:$0xff] }
  0x6d   : > { %625 = vmatprep.subr.mxu1 %v1657_v2  ;;  %v1691_v1 = vld [vmem:[%s2039_s5 + $0x318] sm:$0xff]  ;;  %v394_v2 = vld [vmem:[%s2039_s5 + $0x110] sm:$0xff] }
  0x6f   : > { %467 = vmatpush1.xpose.msra.mxu0 %v360_v3  ;;  %v1690_v3 = vld [vmem:[%s2039_s5 + $0x310] sm:$0xff] }
  0x70   : > { %626 = vmatpush1.xpose.msra.mxu1 %v1656_v4  ;;  %468 = vmatprep.subr.mxu0 %v423_v5  ;;  %v393_v4 = vld [vmem:[%s2039_s5 + $0x108] sm:$0xff] }
  0x71   : > { %627 = vmatprep.subr.mxu1 %v1719_v6  ;;  %v1689_v5 = vld [vmem:[%s2039_s5 + $0x308] sm:$0xff]  ;;  %v428_v6 = vsub.s32 0, %v2086_v41 }
  0x73   : > { %469 = vmatpush2.xpose.msra.mxu0 %v422_v7  ;;  %v392_v7 = vld [vmem:[%s2039_s5 + $0x100] sm:$0xff] }
  0x74   : > { %628 = vmatpush2.xpose.msra.mxu1 %v1718_v8  ;;  %470 = vmatprep.subr.mxu0 %v421_v9  ;;  %v1688_v8 = vld [vmem:[%s2039_s5 + $0x300] sm:$0xff]  ;;  %v429_v9 = vrot.slane %v2098_v49, %v428_v6 }
  0x75   : > { %629 = vmatprep.subr.mxu1 %v1717_v10  ;;  %v1896_v10 = vmov 1966171168  }
  0x77   : > { %471 = vmatpush2.xpose.msra.mxu0 %v420_v11  ;;  %v511_v11 = vunpack.c.l.s4 %v1896_v10 }
  0x78   : > { %630 = vmatpush2.xpose.msra.mxu1 %v1716_v12  ;;  %472 = vmatprep.subr.mxu0 %v419_v13  ;;  %v424_v13 = vstv %s359_s19 }
  0x79   : > { %631 = vmatprep.subr.mxu1 %v1715_v14  ;;  %v512_v12 = vunpack.c.0.s8 %v511_v11 }
  0x7b   : > { %473 = vmatpush2.xpose.msra.mxu0 %v418_v15 }
  0x7c   : > { %632 = vmatpush2.xpose.msra.mxu1 %v1714_v16  ;;  %474 = vmatprep.subr.mxu0 %v417_v17  ;;  %v515_v17 = vsub.s32 %v512_v12, %v2086_v41 }
  0x7d   : > { %633 = vmatprep.subr.mxu1 %v1713_v18 }
  0x7f   : > { %475 = vmatpush2.xpose.msra.mxu0 %v416_v19 }
  0x80   : > { %634 = vmatpush2.xpose.msra.mxu1 %v1712_v20  ;;  %476 = vmatprep.subr.mxu0 %v415_v21 }
  0x81   : > { %635 = vmatprep.subr.mxu1 %v1711_v22 }
  0x83   : > { %477 = vmatpush2.xpose.msra.mxu0 %v414_v23 }
  0x84   : > { %636 = vmatpush2.xpose.msra.mxu1 %v1710_v24  ;;  %478 = vmatprep.subr.mxu0 %v413_v25 }
  0x85   : > { %637 = vmatprep.subr.mxu1 %v1709_v26 }
  0x87   : > { %479 = vmatpush2.xpose.msra.mxu0 %v412_v27 }
  0x88   : > { %638 = vmatpush2.xpose.msra.mxu1 %v1708_v28  ;;  %480 = vmatprep.subr.mxu0 %v411_v29 }
  0x89   : > { %639 = vmatprep.subr.mxu1 %v1707_v30 }
  0x8b   : > { %481 = vmatpush2.xpose.msra.mxu0 %v410_v31 }
  0x8c   : > { %640 = vmatpush2.xpose.msra.mxu1 %v1706_v32  ;;  %482 = vmatprep.subr.mxu0 %v409_v33 }
  0x8d   : > { %641 = vmatprep.subr.mxu1 %v1705_v34 }
  0x8f   : > { %483 = vmatpush2.xpose.msra.mxu0 %v408_v35 }
  0x90   : > { %642 = vmatpush2.xpose.msra.mxu1 %v1704_v37  ;;  %484 = vmatprep.subr.mxu0 %v407_v38 }
  0x91   : > { %643 = vmatprep.subr.mxu1 %v1703_v39 }
  0x93   : > { %485 = vmatpush2.xpose.msra.mxu0 %v406_v40 }
  0x94   : > { %644 = vmatpush2.xpose.msra.mxu1 %v1702_v42  ;;  %486 = vmatprep.subr.mxu0 %v405_v43 }
  0x95   : > { %645 = vmatprep.subr.mxu1 %v1701_v44 }
  0x97   : > { %487 = vmatpush2.xpose.msra.mxu0 %v404_v45 }
  0x98   : > { %646 = vmatpush2.xpose.msra.mxu1 %v1700_v46  ;;  %488 = vmatprep.subr.mxu0 %v403_v47 }
  0x99   : > { %647 = vmatprep.subr.mxu1 %v1699_v48 }
  0x9b   : > { %489 = vmatpush2.xpose.msra.mxu0 %v402_v50 }
  0x9c   : > { %648 = vmatpush2.xpose.msra.mxu1 %v1698_v51  ;;  %490 = vmatprep.subr.mxu0 %v401_v52 }
  0x9d   : > { %649 = vmatprep.subr.mxu1 %v1697_v53 }
  0x9f   : > { %491 = vmatpush2.xpose.msra.mxu0 %v400_v54 }
  0xa0   : > { %650 = vmatpush2.xpose.msra.mxu1 %v1696_v55  ;;  %492 = vmatprep.subr.mxu0 %v399_v56 }
  0xa1   : > { %651 = vmatprep.subr.mxu1 %v1695_v57 }
  0xa3   : > { %493 = vmatpush2.xpose.msra.mxu0 %v398_v58 }
  0xa4   : > { %652 = vmatpush2.xpose.msra.mxu1 %v1694_v59  ;;  %494 = vmatprep.subr.mxu0 %v397_v60 }
  0xa5   : > { %653 = vmatprep.subr.mxu1 %v1693_v61 }
  0xa7   : > { %495 = vmatpush2.xpose.msra.mxu0 %v396_v62 }
  0xa8   : > { %654 = vmatpush2.xpose.msra.mxu1 %v1692_v63  ;;  %496 = vmatprep.subr.mxu0 %v395_v0 }
  0xa9   : > { %655 = vmatprep.subr.mxu1 %v1691_v1 }
  0xab   : > { %497 = vmatpush2.xpose.msra.mxu0 %v394_v2 }
  0xac   : > { %656 = vmatpush2.xpose.msra.mxu1 %v1690_v3  ;;  %498 = vmatprep.subr.mxu0 %v393_v4 }
  0xad   : > { %657 = vmatprep.subr.mxu1 %v1689_v5 }
  0xaf   : > { %499 = vmatpush2.xpose.msra.mxu0 %v392_v7 }
  0xb0   : > { %658 = vmatpush2.xpose.msra.mxu1 %v1688_v8 }
  0xb2   : > { %501 = vmatmul.mubr.f32.vlgmr.msra.gmra.mxu0 %v429_v9 }
  0xb3   : > { %660 = vmatmul.mubr.f32.vlgmr.msra.gmra.mxu1 %v429_v9 }
 0x172   : > { %v502_v14 = vpop.f32.mrf.mxu0 }
 0x173   : > { %v661_v15 = vpop.f32.mrf.mxu1  ;;  %v503_v19 = vadd.f32 %v502_v14, %v424_v13 }
 0x174   : > { %v504_v16 = vpop.f32.mrf.mxu0  ;;  %v662_v20 = vadd.f32 %v661_v15, %v424_v13 }
 0x175   : > { %v663_v18 = vpop.f32.mrf.mxu1  ;;  %v505_v21 = vadd.f32 %v504_v16, %v424_v13 }
 0x176   : > { %v664_v49 = vadd.f32 %v663_v18, %v424_v13 }
 0x177   : > { %v509_v22 = vcombine.low %v503_v19, %v505_v21 }
 0x178   : > { %v668_v23 = vcombine.low %v662_v20, %v664_v49 }
 0x179   : > { %v516_v24 = vrot.slane %v509_v22, %v515_v17 }
 0x17a   : > { %v675_v25 = vrot.slane %v668_v23, %v515_v17  ;;  %689 = sbr.rel (%p1721_p2) target bundleno = 385 (0x181), region = 52 }
 0x17b   : > { %v523_v26 = vrot.slane %v516_v24, %v515_v17 }
 0x17c   : > { %v682_v27 = vrot.slane %v675_v25, %v515_v17 }
 0x17d   : > { %529 = vst.msk [vmem:[%s2188_s27] ss:$2 sm:$0x3] %vm527_vm0, %v523_v26 }
 0x17e   : > { %1720 = vst.msk [vmem:[%s2188_s27 + $0x1] ss:$2 sm:$0x3] %vm527_vm0, %v682_v27 }
 0x17f   : > { %v1897_v41 = vmov -inf   ;;  %v1898_v28 = vmov inf  }
 0x180   : > { %690 = vst [vmem:[#allocation2] sm:$0x3] %v1897_v41  ;;  %691 = vst [vmem:[#allocation3] sm:$0x3] %v1898_v28 }
 0x181 PF: > { %vm709_vm1 = vcmask 1041408   ;;  %v2217_v45 = vand.u32 127, %v426_v36  ;;  %p1723_p3 = scmp.ne.s32.totalorder %s1880_s8, 1 }
 0x182   : > { %s1509_s22 = sld [smem:[#allocation5]] (!%p1723_p3) }
 0x183   : > { %v2220_v46 = vadd.s32 128, %v2217_v45  ;;  %v2223_v47 = vadd.s32 256, %v2217_v45 }
 0x187   : > { %v2194_v29 = vld.sshfl [vmem:[%s2188_s27] sm:$0x33 pattern:$0x76325410]  ;;  %v2196_v30 = vld [vmem:[#allocation2] sm:$0x3] }
 0x188   : > { %v2200_v31 = vcombine.high %v2194_v29, %v2194_v29  ;;  %v2202_v32 = vld [vmem:[#allocation3] sm:$0x3]  ;;  %v710_v33 = vsel %vm709_vm1, %v2196_v30, -inf  ;;  %v711_v34 = vsel %vm709_vm1, %v2194_v29, -inf  ;;  %v1100_v37 = vsel %vm709_vm1, %v2194_v29, inf }
 0x189   : > { %v1099_v35 = vsel %vm709_vm1, %v2202_v32, inf  ;;  %v713_v39 = vmax.f32 %v710_v33, %v711_v34 }
 0x18a   : > { %v712_v38 = vsel %vm709_vm1, %v2200_v31, -inf  ;;  %v1102_v40 = vmin.f32 %v1099_v35, %v1100_v37  ;;  %v1101_v42 = vsel %vm709_vm1, %v2200_v31, inf }
 0x18b   : > { %v714_v43 = vmax.f32 %v713_v39, %v712_v38 }
 0x18c   : > { %v1103_v44 = vmin.f32 %v1102_v40, %v1101_v42 }
 0x18d   : > { %715 = vmax.xlane.f32.xlu0 %v714_v43 }
 0x191   : > { %1104 = vmin.xlane.f32.xlu0 %v1103_v44 }
 0x216   : > { %v2225_v48 = vpop.xlane.xlu0 %715 }
 0x217   : > { %vm717_vm2 = vcmp.eq.f32.partialorder %v2196_v30, %v2225_v48  ;;  %vm718_vm3 = vcmp.eq.f32.partialorder %v2194_v29, %v2225_v48  ;;  %vm719_vm4 = vcmp.eq.f32.partialorder %v2200_v31, %v2225_v48 }
 0x218   : > { %v720_v36 = vsel %vm717_vm2, %v2217_v45, 384  ;;  %v721_v50 = vsel %vm718_vm3, %v2220_v46, 384  ;;  %v722_v51 = vsel %vm719_vm4, %v2223_v47, 384 }
 0x219   : > { %v723_v52 = vsel %vm709_vm1, %v720_v36, 2147483647  ;;  %v724_v53 = vsel %vm709_vm1, %v721_v50, 2147483647  ;;  %v725_v55 = vsel %vm709_vm1, %v722_v51, 2147483647 }
 0x21a   : > { %v2238_v54 = vpop.xlane.xlu0 %1104  ;;  %vm726_vm5 = vcmp.lt.s32.totalorder %v723_v52, %v724_v53 }
 0x21b   : > { %vm1106_vm6 = vcmp.eq.f32.partialorder %v2202_v32, %v2238_v54  ;;  %vm1107_vm7 = vcmp.eq.f32.partialorder %v2194_v29, %v2238_v54  ;;  %vm1108_vm8 = vcmp.eq.f32.partialorder %v2200_v31, %v2238_v54  ;;  %v727_v58 = vsel %vm726_vm5, %v723_v52, %v724_v53 }
 0x21c   : > { %v1109_v56 = vsel %vm1106_vm6, %v2217_v45, 384  ;;  %v1110_v57 = vsel %vm1107_vm7, %v2220_v46, 384  ;;  %v1111_v59 = vsel %vm1108_vm8, %v2223_v47, 384  ;;  %vm728_vm9 = vcmp.lt.s32.totalorder %v727_v58, %v725_v55 }
 0x21d   : > { %v1112_v60 = vsel %vm709_vm1, %v1109_v56, 2147483647  ;;  %v1113_v61 = vsel %vm709_vm1, %v1110_v57, 2147483647  ;;  %v729_v62 = vsel %vm728_vm9, %v727_v58, %v725_v55  ;;  %v1114_v0 = vsel %vm709_vm1, %v1111_v59, 2147483647 }
 0x21e   : > { %vm1115_vm10 = vcmp.lt.s32.totalorder %v1112_v60, %v1113_v61  ;;  %v731_v63 = vshra.s32 %v729_v62, 16  ;;  %v730_v6 = vand.u32 65535, %v729_v62 }
 0x21f   : > { %v1116_v1 = vsel %vm1115_vm10, %v1112_v60, %v1113_v61 }
 0x220   : > { %vm1117_vm11 = vcmp.lt.s32.totalorder %v1116_v1, %v1114_v0  ;;  %v733_v2 = vcvt.s32.f32 %v731_v63  ;;  %v732_v8 = vcvt.s32.f32 %v730_v6 }
 0x221   : > { %v1118_v3 = vsel %vm1117_vm11, %v1116_v1, %v1114_v0 }
 0x222   : > { %v1120_v4 = vshra.s32 %v1118_v3, 16  ;;  %734 = vmin.xlane.f32.xlu1 %v733_v2  ;;  %v1119_v9 = vand.u32 65535, %v1118_v3 }
 0x224   : > { %v1122_v5 = vcvt.s32.f32 %v1120_v4  ;;  %v1121_v12 = vcvt.s32.f32 %v1119_v9 }
 0x226   : > { %1123 = vmin.xlane.f32.xlu1 %v1122_v5 }
 0x2ab   : > { %v735_v7 = vpop.xlane.xlu1 %734 }
 0x2ac   : > { %vm736_vm12 = vcmp.eq.f32.partialorder %v733_v2, %v735_v7  ;;  %v741_v14 = vcvt.f32.s32 %v735_v7 }
 0x2ad   : > { %v737_v10 = vsel %vm736_vm12, %v732_v8, inf }
 0x2ae   : > { %738 = vmin.xlane.f32.xlu0 %v737_v10  ;;  %v742_v17 = vshll.u32 %v741_v14, 16 }
 0x2af   : > { %v1124_v11 = vpop.xlane.xlu1 %1123 }
 0x2b0   : > { %vm1125_vm13 = vcmp.eq.f32.partialorder %v1122_v5, %v1124_v11  ;;  %v1130_v15 = vcvt.f32.s32 %v1124_v11 }
 0x2b1   : > { %v1126_v13 = vsel %vm1125_vm13, %v1121_v12, inf }
 0x2b2   : > { %1127 = vmin.xlane.f32.xlu1 %v1126_v13  ;;  %v1131_v20 = vshll.u32 %v1130_v15, 16 }
 0x337   : > { %v739_v16 = vpop.xlane.xlu0 %738 }
 0x338   : > { %v740_v18 = vcvt.f32.s32 %v739_v16 }
 0x33a   : > { %v743_v19 = vadd.s32 %v742_v17, %v740_v18 }
 0x33b   : > { %v1128_v21 = vpop.xlane.xlu1 %1127 }
 0x33c   : > { %vm744_vm14 = vcmp.eq.s32.totalorder %v2217_v45, %v743_v19  ;;  %vm745_vm15 = vcmp.eq.s32.totalorder %v2220_v46, %v743_v19  ;;  %v1129_v49 = vcvt.f32.s32 %v1128_v21  ;;  %vm746_vm0 = vcmp.eq.s32.totalorder %v2223_v47, %v743_v19 }
 0x33d   : > { %v2257_v22 = vsel %vm744_vm14, -inf, %v2196_v30  ;;  %v2260_v23 = vsel %vm745_vm15, -inf, %v2194_v29  ;;  %v2263_v24 = vsel %vm746_vm0, -inf, %v2200_v31 }
 0x33e   : > { %v1132_v25 = vadd.s32 %v1131_v20, %v1129_v49  ;;  %v752_v26 = vsel %vm709_vm1, %v2257_v22, -inf  ;;  %v753_v27 = vsel %vm709_vm1, %v2260_v23, -inf  ;;  %v754_v28 = vsel %vm709_vm1, %v2263_v24, -inf }
 0x33f   : > { %v755_v41 = vmax.f32 %v752_v26, %v753_v27 }
 0x340   : > { %vm1133_vm2 = vcmp.eq.s32.totalorder %v2217_v45, %v1132_v25  ;;  %vm1134_vm3 = vcmp.eq.s32.totalorder %v2220_v46, %v1132_v25  ;;  %vm1135_vm4 = vcmp.eq.s32.totalorder %v2223_v47, %v1132_v25 }
 0x341   : > { %v756_v30 = vmax.f32 %v755_v41, %v754_v28  ;;  %v2275_v33 = vsel %vm1133_vm2, inf, %v2202_v32  ;;  %v2278_v34 = vsel %vm1134_vm3, inf, %v2194_v29  ;;  %v2281_v35 = vsel %vm1135_vm4, inf, %v2200_v31 }
 0x342   : > { %v1140_v37 = vsel %vm709_vm1, %v2275_v33, inf  ;;  %v1141_v38 = vsel %vm709_vm1, %v2278_v34, inf  ;;  %v1142_v40 = vsel %vm709_vm1, %v2281_v35, inf }
 0x343   : > { %757 = vmax.xlane.f32.xlu0 %v756_v30  ;;  %v1143_v39 = vmin.f32 %v1140_v37, %v1141_v38 }
 0x345   : > { %v1144_v42 = vmin.f32 %v1143_v39, %v1142_v40 }
 0x347   : > { %1145 = vmin.xlane.f32.xlu1 %v1144_v42 }
 0x3cc   : > { %v2289_v32 = vpop.xlane.xlu0 %757 }
 0x3cd   : > { %vm759_vm5 = vcmp.eq.f32.partialorder %v2257_v22, %v2289_v32  ;;  %vm760_vm6 = vcmp.eq.f32.partialorder %v2260_v23, %v2289_v32  ;;  %vm761_vm7 = vcmp.eq.f32.partialorder %v2263_v24, %v2289_v32 }
 0x3ce   : > { %v762_v29 = vsel %vm759_vm5, %v2217_v45, 384  ;;  %v763_v31 = vsel %vm760_vm6, %v2220_v46, 384  ;;  %v764_v43 = vsel %vm761_vm7, %v2223_v47, 384 }
 0x3cf   : > { %v765_v44 = vsel %vm709_vm1, %v762_v29, 2147483647  ;;  %v766_v36 = vsel %vm709_vm1, %v763_v31, 2147483647  ;;  %v767_v51 = vsel %vm709_vm1, %v764_v43, 2147483647 }
 0x3d0   : > { %v2302_v50 = vpop.xlane.xlu1 %1145  ;;  %vm768_vm8 = vcmp.lt.s32.totalorder %v765_v44, %v766_v36 }
 0x3d1   : > { %vm1147_vm9 = vcmp.eq.f32.partialorder %v2275_v33, %v2302_v50  ;;  %vm1148_vm10 = vcmp.eq.f32.partialorder %v2278_v34, %v2302_v50  ;;  %vm1149_vm11 = vcmp.eq.f32.partialorder %v2281_v35, %v2302_v50  ;;  %v769_v55 = vsel %vm768_vm8, %v765_v44, %v766_v36 }
 0x3d2   : > { %v1150_v52 = vsel %vm1147_vm9, %v2217_v45, 384  ;;  %v1151_v53 = vsel %vm1148_vm10, %v2220_v46, 384  ;;  %v1152_v56 = vsel %vm1149_vm11, %v2223_v47, 384  ;;  %vm770_vm12 = vcmp.lt.s32.totalorder %v769_v55, %v767_v51 }
 0x3d3   : > { %v1153_v57 = vsel %vm709_vm1, %v1150_v52, 2147483647  ;;  %v1154_v58 = vsel %vm709_vm1, %v1151_v53, 2147483647  ;;  %v771_v59 = vsel %vm770_vm12, %v769_v55, %v767_v51  ;;  %v1155_v61 = vsel %vm709_vm1, %v1152_v56, 2147483647 }
 0x3d4   : > { %vm1156_vm13 = vcmp.lt.s32.totalorder %v1153_v57, %v1154_v58  ;;  %v773_v60 = vshra.s32 %v771_v59, 16  ;;  %v772_v3 = vand.u32 65535, %v771_v59 }
 0x3d5   : > { %v1157_v62 = vsel %vm1156_vm13, %v1153_v57, %v1154_v58 }
 0x3d6   : > { %vm1158_vm14 = vcmp.lt.s32.totalorder %v1157_v62, %v1155_v61  ;;  %v775_v63 = vcvt.s32.f32 %v773_v60  ;;  %v774_v6 = vcvt.s32.f32 %v772_v3 }
 0x3d7   : > { %v1159_v0 = vsel %vm1158_vm14, %v1157_v62, %v1155_v61 }
 0x3d8   : > { %v1161_v1 = vshra.s32 %v1159_v0, 16  ;;  %776 = vmin.xlane.f32.xlu0 %v775_v63  ;;  %v1160_v4 = vand.u32 65535, %v1159_v0 }
 0x3da   : > { %v1163_v2 = vcvt.s32.f32 %v1161_v1  ;;  %v1162_v9 = vcvt.s32.f32 %v1160_v4 }
 0x3dc   : > { %1164 = vmin.xlane.f32.xlu1 %v1163_v2 }
 0x461   : > { %v777_v5 = vpop.xlane.xlu0 %776 }
 0x462   : > { %vm778_vm15 = vcmp.eq.f32.partialorder %v775_v63, %v777_v5  ;;  %v783_v11 = vcvt.f32.s32 %v777_v5 }
 0x463   : > { %v779_v7 = vsel %vm778_vm15, %v774_v6, inf }
 0x464   : > { %780 = vmin.xlane.f32.xlu0 %v779_v7  ;;  %v784_v14 = vshll.u32 %v783_v11, 16 }
 0x465   : > { %v1165_v8 = vpop.xlane.xlu1 %1164 }
 0x466   : > { %vm1166_vm0 = vcmp.eq.f32.partialorder %v1163_v2, %v1165_v8  ;;  %v1171_v12 = vcvt.f32.s32 %v1165_v8 }
 0x467   : > { %v1167_v10 = vsel %vm1166_vm0, %v1162_v9, inf }
 0x468   : > { %1168 = vmin.xlane.f32.xlu1 %v1167_v10  ;;  %v1172_v18 = vshll.u32 %v1171_v12, 16 }
 0x4ed   : > { %v781_v13 = vpop.xlane.xlu0 %780 }
 0x4ee   : > { %v782_v15 = vcvt.f32.s32 %v781_v13 }
 0x4f0   : > { %v785_v16 = vadd.s32 %v784_v14, %v782_v15 }
 0x4f1   : > { %v1169_v17 = vpop.xlane.xlu1 %1168 }
 0x4f2   : > { %v1170_v19 = vcvt.f32.s32 %v1169_v17  ;;  %vm786_vm2 = vcmp.eq.s32.totalorder %v2217_v45, %v785_v16  ;;  %vm787_vm3 = vcmp.eq.s32.totalorder %v2220_v46, %v785_v16  ;;  %vm788_vm4 = vcmp.eq.s32.totalorder %v2223_v47, %v785_v16 }
 0x4f3   : > { %v2321_v21 = vsel %vm786_vm2, -inf, %v2257_v22  ;;  %v2324_v49 = vsel %vm787_vm3, -inf, %v2260_v23  ;;  %v2327_v25 = vsel %vm788_vm4, -inf, %v2263_v24 }
 0x4f4   : > { %v1173_v20 = vadd.s32 %v1172_v18, %v1170_v19  ;;  %v794_v26 = vsel %vm709_vm1, %v2321_v21, -inf  ;;  %v795_v27 = vsel %vm709_vm1, %v2324_v49, -inf  ;;  %v796_v22 = vsel %vm709_vm1, %v2327_v25, -inf }
 0x4f5   : > { %v797_v41 = vmax.f32 %v794_v26, %v795_v27 }
 0x4f6   : > { %vm1174_vm5 = vcmp.eq.s32.totalorder %v2217_v45, %v1173_v20  ;;  %vm1175_vm6 = vcmp.eq.s32.totalorder %v2220_v46, %v1173_v20  ;;  %vm1176_vm7 = vcmp.eq.s32.totalorder %v2223_v47, %v1173_v20 }
 0x4f7   : > { %v2339_v23 = vsel %vm1174_vm5, inf, %v2275_v33  ;;  %v2342_v24 = vsel %vm1175_vm6, inf, %v2278_v34  ;;  %v2345_v28 = vsel %vm1176_vm7, inf, %v2281_v35  ;;  %v798_v30 = vmax.f32 %v797_v41, %v796_v22 }
 0x4f8   : > { %v1181_v37 = vsel %vm709_vm1, %v2339_v23, inf  ;;  %v1182_v38 = vsel %vm709_vm1, %v2342_v24, inf  ;;  %v1183_v40 = vsel %vm709_vm1, %v2345_v28, inf }
 0x4f9   : > { %v1184_v39 = vmin.f32 %v1181_v37, %v1182_v38  ;;  %799 = vmax.xlane.f32.xlu0 %v798_v30 }
 0x4fb   : > { %v1185_v33 = vmin.f32 %v1184_v39, %v1183_v40 }
 0x4fd   : > { %1186 = vmin.xlane.f32.xlu1 %v1185_v33 }
 0x582   : > { %v2353_v42 = vpop.xlane.xlu0 %799 }
 0x583   : > { %vm801_vm8 = vcmp.eq.f32.partialorder %v2321_v21, %v2353_v42  ;;  %vm802_vm9 = vcmp.eq.f32.partialorder %v2324_v49, %v2353_v42  ;;  %vm803_vm10 = vcmp.eq.f32.partialorder %v2327_v25, %v2353_v42 }
 0x584   : > { %v804_v34 = vsel %vm801_vm8, %v2217_v45, 384  ;;  %v805_v35 = vsel %vm802_vm9, %v2220_v46, 384  ;;  %v806_v31 = vsel %vm803_vm10, %v2223_v47, 384 }
 0x585   : > { %v807_v43 = vsel %vm709_vm1, %v804_v34, 2147483647  ;;  %v808_v44 = vsel %vm709_vm1, %v805_v35, 2147483647  ;;  %v809_v53 = vsel %vm709_vm1, %v806_v31, 2147483647 }
 0x586   : > { %v2363_v29 = vpop.xlane.xlu1 %1186  ;;  %vm810_vm14 = vcmp.lt.s32.totalorder %v807_v43, %v808_v44 }
 0x587   : > { %vm1188_vm11 = vcmp.eq.f32.partialorder %v2339_v23, %v2363_v29  ;;  %vm1189_vm12 = vcmp.eq.f32.partialorder %v2342_v24, %v2363_v29  ;;  %vm1190_vm13 = vcmp.eq.f32.partialorder %v2345_v28, %v2363_v29  ;;  %v811_v55 = vsel %vm810_vm14, %v807_v43, %v808_v44 }
 0x588   : > { %v1191_v36 = vsel %vm1188_vm11, %v2217_v45, 384  ;;  %v1192_v51 = vsel %vm1189_vm12, %v2220_v46, 384  ;;  %v1193_v52 = vsel %vm1190_vm13, %v2223_v47, 384  ;;  %vm812_vm15 = vcmp.lt.s32.totalorder %v811_v55, %v809_v53 }
 0x589   : > { %v1194_v56 = vsel %vm709_vm1, %v1191_v36, 2147483647  ;;  %v1195_v57 = vsel %vm709_vm1, %v1192_v51, 2147483647  ;;  %v813_v58 = vsel %vm812_vm15, %v811_v55, %v809_v53  ;;  %v1196_v59 = vsel %vm709_vm1, %v1193_v52, 2147483647 }
 0x58a   : > { %vm1197_vm0 = vcmp.lt.s32.totalorder %v1194_v56, %v1195_v57  ;;  %v815_v61 = vshra.s32 %v813_v58, 16  ;;  %v814_v2 = vand.u32 65535, %v813_v58 }
 0x58b   : > { %v1198_v60 = vsel %vm1197_vm0, %v1194_v56, %v1195_v57 }
 0x58c   : > { %vm1199_vm2 = vcmp.lt.s32.totalorder %v1198_v60, %v1196_v59  ;;  %v817_v63 = vcvt.s32.f32 %v815_v61  ;;  %v816_v5 = vcvt.s32.f32 %v814_v2 }
 0x58d   : > { %v1200_v62 = vsel %vm1199_vm2, %v1198_v60, %v1196_v59 }
 0x58e   : > { %v1202_v0 = vshra.s32 %v1200_v62, 16  ;;  %818 = vmin.xlane.f32.xlu0 %v817_v63  ;;  %v1201_v3 = vand.u32 65535, %v1200_v62 }
 0x590   : > { %v1204_v1 = vcvt.s32.f32 %v1202_v0  ;;  %v1203_v8 = vcvt.s32.f32 %v1201_v3 }
 0x592   : > { %1205 = vmin.xlane.f32.xlu1 %v1204_v1 }
 0x617   : > { %v819_v4 = vpop.xlane.xlu0 %818 }
 0x618   : > { %vm820_vm3 = vcmp.eq.f32.partialorder %v817_v63, %v819_v4  ;;  %v825_v10 = vcvt.f32.s32 %v819_v4 }
 0x619   : > { %v821_v6 = vsel %vm820_vm3, %v816_v5, inf }
 0x61a   : > { %822 = vmin.xlane.f32.xlu0 %v821_v6  ;;  %v826_v13 = vshll.u32 %v825_v10, 16 }
 0x61b   : > { %v1206_v7 = vpop.xlane.xlu1 %1205 }
 0x61c   : > { %vm1207_vm4 = vcmp.eq.f32.partialorder %v1204_v1, %v1206_v7  ;;  %v1212_v11 = vcvt.f32.s32 %v1206_v7 }
 0x61d   : > { %v1208_v9 = vsel %vm1207_vm4, %v1203_v8, inf }
 0x61e   : > { %1209 = vmin.xlane.f32.xlu1 %v1208_v9  ;;  %v1213_v16 = vshll.u32 %v1212_v11, 16 }
 0x6a3   : > { %v823_v12 = vpop.xlane.xlu0 %822 }
 0x6a4   : > { %v824_v14 = vcvt.f32.s32 %v823_v12 }
 0x6a6   : > { %v827_v17 = vadd.s32 %v826_v13, %v824_v14 }
 0x6a7   : > { %v1210_v15 = vpop.xlane.xlu1 %1209 }
 0x6a8   : > { %v1211_v18 = vcvt.f32.s32 %v1210_v15  ;;  %vm828_vm5 = vcmp.eq.s32.totalorder %v2217_v45, %v827_v17  ;;  %vm829_vm6 = vcmp.eq.s32.totalorder %v2220_v46, %v827_v17  ;;  %vm830_vm7 = vcmp.eq.s32.totalorder %v2223_v47, %v827_v17 }
 0x6a9   : > { %v2385_v20 = vsel %vm828_vm5, -inf, %v2321_v21  ;;  %v2388_v26 = vsel %vm829_vm6, -inf, %v2324_v49  ;;  %v2391_v27 = vsel %vm830_vm7, -inf, %v2327_v25 }
 0x6aa   : > { %v1214_v19 = vadd.s32 %v1213_v16, %v1211_v18  ;;  %v836_v41 = vsel %vm709_vm1, %v2385_v20, -inf  ;;  %v837_v22 = vsel %vm709_vm1, %v2388_v26, -inf  ;;  %v838_v49 = vsel %vm709_vm1, %v2391_v27, -inf }
 0x6ab   : > { %v839_v30 = vmax.f32 %v836_v41, %v837_v22 }
 0x6ac   : > { %vm1215_vm8 = vcmp.eq.s32.totalorder %v2217_v45, %v1214_v19  ;;  %vm1216_vm9 = vcmp.eq.s32.totalorder %v2220_v46, %v1214_v19  ;;  %vm1217_vm10 = vcmp.eq.s32.totalorder %v2223_v47, %v1214_v19 }
 0x6ad   : > { %v2401_v21 = vsel %vm1215_vm8, inf, %v2339_v23  ;;  %v2406_v25 = vsel %vm1216_vm9, inf, %v2342_v24  ;;  %v2409_v37 = vsel %vm1217_vm10, inf, %v2345_v28  ;;  %v840_v39 = vmax.f32 %v839_v30, %v838_v49 }
 0x6ae   : > { %v1222_v38 = vsel %vm709_vm1, %v2401_v21, inf  ;;  %v1223_v40 = vsel %vm709_vm1, %v2406_v25, inf  ;;  %v1224_v23 = vsel %vm709_vm1, %v2409_v37, inf }
 0x6af   : > { %v1225_v33 = vmin.f32 %v1222_v38, %v1223_v40  ;;  %841 = vmax.xlane.f32.xlu0 %v840_v39 }
 0x6b1   : > { %v1226_v34 = vmin.f32 %v1225_v33, %v1224_v23 }
 0x6b3   : > { %1227 = vmin.xlane.f32.xlu1 %v1226_v34 }
 0x738   : > { %v2417_v35 = vpop.xlane.xlu0 %841 }
 0x739   : > { %vm843_vm11 = vcmp.eq.f32.partialorder %v2385_v20, %v2417_v35  ;;  %vm844_vm12 = vcmp.eq.f32.partialorder %v2388_v26, %v2417_v35  ;;  %vm845_vm13 = vcmp.eq.f32.partialorder %v2391_v27, %v2417_v35 }
 0x73a   : > { %v846_v24 = vsel %vm843_vm11, %v2217_v45, 384  ;;  %v847_v28 = vsel %vm844_vm12, %v2220_v46, 384  ;;  %v848_v43 = vsel %vm845_vm13, %v2223_v47, 384 }
 0x73b   : > { %v849_v44 = vsel %vm709_vm1, %v846_v24, 2147483647  ;;  %v850_v36 = vsel %vm709_vm1, %v847_v28, 2147483647  ;;  %v851_v55 = vsel %vm709_vm1, %v848_v43, 2147483647 }
 0x73c   : > { %v2427_v31 = vpop.xlane.xlu1 %1227  ;;  %vm852_vm2 = vcmp.lt.s32.totalorder %v849_v44, %v850_v36 }
 0x73d   : > { %vm1229_vm14 = vcmp.eq.f32.partialorder %v2401_v21, %v2427_v31  ;;  %vm1230_vm15 = vcmp.eq.f32.partialorder %v2406_v25, %v2427_v31  ;;  %vm1231_vm0 = vcmp.eq.f32.partialorder %v2409_v37, %v2427_v31  ;;  %v853_v56 = vsel %vm852_vm2, %v849_v44, %v850_v36 }
 0x73e   : > { %v1232_v51 = vsel %vm1229_vm14, %v2217_v45, 384  ;;  %v1233_v52 = vsel %vm1230_vm15, %v2220_v46, 384  ;;  %v1234_v53 = vsel %vm1231_vm0, %v2223_v47, 384  ;;  %vm854_vm3 = vcmp.lt.s32.totalorder %v853_v56, %v851_v55 }
 0x73f   : > { %v1235_v57 = vsel %vm709_vm1, %v1232_v51, 2147483647  ;;  %v1236_v58 = vsel %vm709_vm1, %v1233_v52, 2147483647  ;;  %v855_v59 = vsel %vm854_vm3, %v853_v56, %v851_v55  ;;  %v1237_v60 = vsel %vm709_vm1, %v1234_v53, 2147483647 }
 0x740   : > { %vm1238_vm4 = vcmp.lt.s32.totalorder %v1235_v57, %v1236_v58  ;;  %v857_v62 = vshra.s32 %v855_v59, 16  ;;  %v856_v3 = vand.u32 65535, %v855_v59 }
 0x741   : > { %v1239_v61 = vsel %vm1238_vm4, %v1235_v57, %v1236_v58 }
 0x742   : > { %vm1240_vm5 = vcmp.lt.s32.totalorder %v1239_v61, %v1237_v60  ;;  %v859_v0 = vcvt.s32.f32 %v857_v62  ;;  %v858_v6 = vcvt.s32.f32 %v856_v3 }
 0x743   : > { %v1241_v63 = vsel %vm1240_vm5, %v1239_v61, %v1237_v60 }
 0x744   : > { %v1243_v1 = vshra.s32 %v1241_v63, 16  ;;  %860 = vmin.xlane.f32.xlu0 %v859_v0  ;;  %v1242_v4 = vand.u32 65535, %v1241_v63 }
 0x746   : > { %v1245_v2 = vcvt.s32.f32 %v1243_v1  ;;  %v1244_v9 = vcvt.s32.f32 %v1242_v4 }
 0x748   : > { %1246 = vmin.xlane.f32.xlu1 %v1245_v2 }
 0x7cd   : > { %v861_v5 = vpop.xlane.xlu0 %860 }
 0x7ce   : > { %vm862_vm6 = vcmp.eq.f32.partialorder %v859_v0, %v861_v5  ;;  %v867_v11 = vcvt.f32.s32 %v861_v5 }
 0x7cf   : > { %v863_v7 = vsel %vm862_vm6, %v858_v6, inf }
 0x7d0   : > { %864 = vmin.xlane.f32.xlu0 %v863_v7  ;;  %v868_v14 = vshll.u32 %v867_v11, 16 }
 0x7d1   : > { %v1247_v8 = vpop.xlane.xlu1 %1246 }
 0x7d2   : > { %vm1248_vm7 = vcmp.eq.f32.partialorder %v1245_v2, %v1247_v8  ;;  %v1253_v12 = vcvt.f32.s32 %v1247_v8 }
 0x7d3   : > { %v1249_v10 = vsel %vm1248_vm7, %v1244_v9, inf }
 0x7d4   : > { %1250 = vmin.xlane.f32.xlu1 %v1249_v10  ;;  %v1254_v17 = vshll.u32 %v1253_v12, 16 }
 0x859   : > { %v865_v13 = vpop.xlane.xlu0 %864 }
 0x85a   : > { %v866_v15 = vcvt.f32.s32 %v865_v13 }
 0x85c   : > { %v869_v18 = vadd.s32 %v868_v14, %v866_v15 }
 0x85d   : > { %v1251_v16 = vpop.xlane.xlu1 %1250 }
 0x85e   : > { %v1252_v19 = vcvt.f32.s32 %v1251_v16  ;;  %vm870_vm8 = vcmp.eq.s32.totalorder %v2217_v45, %v869_v18  ;;  %vm871_vm9 = vcmp.eq.s32.totalorder %v2220_v46, %v869_v18  ;;  %vm872_vm10 = vcmp.eq.s32.totalorder %v2223_v47, %v869_v18 }
 0x85f   : > { %v2449_v22 = vsel %vm870_vm8, -inf, %v2385_v20  ;;  %v2452_v30 = vsel %vm871_vm9, -inf, %v2388_v26  ;;  %v2455_v49 = vsel %vm872_vm10, -inf, %v2391_v27 }
 0x860   : > { %v1255_v41 = vadd.s32 %v1254_v17, %v1252_v19  ;;  %v878_v38 = vsel %vm709_vm1, %v2449_v22, -inf  ;;  %v879_v39 = vsel %vm709_vm1, %v2452_v30, -inf  ;;  %v880_v26 = vsel %vm709_vm1, %v2455_v49, -inf }
 0x861   : > { %v881_v40 = vmax.f32 %v878_v38, %v879_v39 }
 0x862   : > { %vm1256_vm11 = vcmp.eq.s32.totalorder %v2217_v45, %v1255_v41  ;;  %vm1257_vm12 = vcmp.eq.s32.totalorder %v2220_v46, %v1255_v41  ;;  %vm1258_vm13 = vcmp.eq.s32.totalorder %v2223_v47, %v1255_v41 }
 0x863   : > { %v2465_v20 = vsel %vm1256_vm11, inf, %v2401_v21  ;;  %v2470_v27 = vsel %vm1257_vm12, inf, %v2406_v25  ;;  %v2473_v33 = vsel %vm1258_vm13, inf, %v2409_v37  ;;  %v882_v34 = vmax.f32 %v881_v40, %v880_v26 }
 0x864   : > { %v1263_v23 = vsel %vm709_vm1, %v2465_v20, inf  ;;  %v1264_v24 = vsel %vm709_vm1, %v2470_v27, inf  ;;  %v1265_v21 = vsel %vm709_vm1, %v2473_v33, inf }
 0x865   : > { %v1266_v28 = vmin.f32 %v1263_v23, %v1264_v24  ;;  %883 = vmax.xlane.f32.xlu0 %v882_v34 }
 0x867   : > { %v1267_v43 = vmin.f32 %v1266_v28, %v1265_v21 }
 0x869   : > { %1268 = vmin.xlane.f32.xlu1 %v1267_v43 }
 0x8ee   : > { %v2481_v44 = vpop.xlane.xlu0 %883 }
 0x8ef   : > { %vm885_vm14 = vcmp.eq.f32.partialorder %v2449_v22, %v2481_v44  ;;  %vm886_vm15 = vcmp.eq.f32.partialorder %v2452_v30, %v2481_v44  ;;  %vm887_vm0 = vcmp.eq.f32.partialorder %v2455_v49, %v2481_v44 }
 0x8f0   : > { %v888_v25 = vsel %vm885_vm14, %v2217_v45, 384  ;;  %v889_v37 = vsel %vm886_vm15, %v2220_v46, 384  ;;  %v890_v51 = vsel %vm887_vm0, %v2223_v47, 384 }
 0x8f1   : > { %v891_v52 = vsel %vm709_vm1, %v888_v25, 2147483647  ;;  %v892_v53 = vsel %vm709_vm1, %v889_v37, 2147483647  ;;  %v893_v58 = vsel %vm709_vm1, %v890_v51, 2147483647 }
 0x8f2   : > { %v2491_v36 = vpop.xlane.xlu1 %1268  ;;  %vm894_vm5 = vcmp.lt.s32.totalorder %v891_v52, %v892_v53 }
 0x8f3   : > { %vm1270_vm2 = vcmp.eq.f32.partialorder %v2465_v20, %v2491_v36  ;;  %vm1271_vm3 = vcmp.eq.f32.partialorder %v2470_v27, %v2491_v36  ;;  %vm1272_vm4 = vcmp.eq.f32.partialorder %v2473_v33, %v2491_v36  ;;  %v895_v59 = vsel %vm894_vm5, %v891_v52, %v892_v53 }
 0x8f4   : > { %v1273_v55 = vsel %vm1270_vm2, %v2217_v45, 384  ;;  %v1274_v56 = vsel %vm1271_vm3, %v2220_v46, 384  ;;  %v1275_v57 = vsel %vm1272_vm4, %v2223_v47, 384  ;;  %vm896_vm6 = vcmp.lt.s32.totalorder %v895_v59, %v893_v58 }
 0x8f5   : > { %v1276_v60 = vsel %vm709_vm1, %v1273_v55, 2147483647  ;;  %v1277_v61 = vsel %vm709_vm1, %v1274_v56, 2147483647  ;;  %v897_v62 = vsel %vm896_vm6, %v895_v59, %v893_v58  ;;  %v1278_v63 = vsel %vm709_vm1, %v1275_v57, 2147483647 }
 0x8f6   : > { %vm1279_vm7 = vcmp.lt.s32.totalorder %v1276_v60, %v1277_v61  ;;  %v899_v1 = vshra.s32 %v897_v62, 16  ;;  %v898_v6 = vand.u32 65535, %v897_v62 }
 0x8f7   : > { %v1280_v0 = vsel %vm1279_vm7, %v1276_v60, %v1277_v61 }
 0x8f8   : > { %vm1281_vm8 = vcmp.lt.s32.totalorder %v1280_v0, %v1278_v63  ;;  %v901_v3 = vcvt.s32.f32 %v899_v1  ;;  %v900_v9 = vcvt.s32.f32 %v898_v6 }
 0x8f9   : > { %v1282_v2 = vsel %vm1281_vm8, %v1280_v0, %v1278_v63 }
 0x8fa   : > { %v1284_v4 = vshra.s32 %v1282_v2, 16  ;;  %902 = vmin.xlane.f32.xlu0 %v901_v3  ;;  %v1283_v7 = vand.u32 65535, %v1282_v2 }
 0x8fc   : > { %v1286_v5 = vcvt.s32.f32 %v1284_v4  ;;  %v1285_v12 = vcvt.s32.f32 %v1283_v7 }
 0x8fe   : > { %1287 = vmin.xlane.f32.xlu1 %v1286_v5 }
 0x983   : > { %v903_v8 = vpop.xlane.xlu0 %902 }
 0x984   : > { %vm904_vm9 = vcmp.eq.f32.partialorder %v901_v3, %v903_v8  ;;  %v909_v14 = vcvt.f32.s32 %v903_v8 }
 0x985   : > { %v905_v10 = vsel %vm904_vm9, %v900_v9, inf }
 0x986   : > { %906 = vmin.xlane.f32.xlu0 %v905_v10  ;;  %v910_v17 = vshll.u32 %v909_v14, 16 }
 0x987   : > { %v1288_v11 = vpop.xlane.xlu1 %1287 }
 0x988   : > { %vm1289_vm10 = vcmp.eq.f32.partialorder %v1286_v5, %v1288_v11  ;;  %v1294_v15 = vcvt.f32.s32 %v1288_v11 }
 0x989   : > { %v1290_v13 = vsel %vm1289_vm10, %v1285_v12, inf }
 0x98a   : > { %1291 = vmin.xlane.f32.xlu1 %v1290_v13  ;;  %v1295_v41 = vshll.u32 %v1294_v15, 16 }
 0xa0f   : > { %v907_v16 = vpop.xlane.xlu0 %906 }
 0xa10   : > { %v908_v18 = vcvt.f32.s32 %v907_v16 }
 0xa12   : > { %v911_v38 = vadd.s32 %v910_v17, %v908_v18 }
 0xa13   : > { %v1292_v19 = vpop.xlane.xlu1 %1291 }
 0xa14   : > { %v1293_v39 = vcvt.f32.s32 %v1292_v19  ;;  %vm912_vm11 = vcmp.eq.s32.totalorder %v2217_v45, %v911_v38  ;;  %vm913_vm12 = vcmp.eq.s32.totalorder %v2220_v46, %v911_v38  ;;  %vm914_vm13 = vcmp.eq.s32.totalorder %v2223_v47, %v911_v38 }
 0xa15   : > { %v2513_v26 = vsel %vm912_vm11, -inf, %v2449_v22  ;;  %v2516_v23 = vsel %vm913_vm12, -inf, %v2452_v30  ;;  %v2519_v34 = vsel %vm914_vm13, -inf, %v2455_v49 }
 0xa16   : > { %v1296_v40 = vadd.s32 %v1295_v41, %v1293_v39  ;;  %v920_v24 = vsel %vm709_vm1, %v2513_v26, -inf  ;;  %v921_v28 = vsel %vm709_vm1, %v2516_v23, -inf  ;;  %v922_v30 = vsel %vm709_vm1, %v2519_v34, -inf }
 0xa17   : > { %v923_v21 = vmax.f32 %v920_v24, %v921_v28 }
 0xa18   : > { %vm1297_vm14 = vcmp.eq.s32.totalorder %v2217_v45, %v1296_v40  ;;  %vm1298_vm15 = vcmp.eq.s32.totalorder %v2220_v46, %v1296_v40  ;;  %vm1299_vm0 = vcmp.eq.s32.totalorder %v2223_v47, %v1296_v40 }
 0xa19   : > { %v2529_v22 = vsel %vm1297_vm14, inf, %v2465_v20  ;;  %v2534_v49 = vsel %vm1298_vm15, inf, %v2470_v27  ;;  %v2537_v43 = vsel %vm1299_vm0, inf, %v2473_v33  ;;  %v924_v37 = vmax.f32 %v923_v21, %v922_v30 }
 0xa1a   : > { %v1304_v25 = vsel %vm709_vm1, %v2529_v22, inf  ;;  %v1305_v51 = vsel %vm709_vm1, %v2534_v49, inf  ;;  %v1306_v20 = vsel %vm709_vm1, %v2537_v43, inf }
 0xa1b   : > { %v1307_v52 = vmin.f32 %v1304_v25, %v1305_v51  ;;  %925 = vmax.xlane.f32.xlu0 %v924_v37 }
 0xa1d   : > { %v1308_v53 = vmin.f32 %v1307_v52, %v1306_v20 }
 0xa1f   : > { %1309 = vmin.xlane.f32.xlu1 %v1308_v53 }
 0xaa4   : > { %v2545_v55 = vpop.xlane.xlu0 %925 }
 0xaa5   : > { %vm927_vm2 = vcmp.eq.f32.partialorder %v2513_v26, %v2545_v55  ;;  %vm928_vm3 = vcmp.eq.f32.partialorder %v2516_v23, %v2545_v55  ;;  %vm929_vm4 = vcmp.eq.f32.partialorder %v2519_v34, %v2545_v55 }
 0xaa6   : > { %v930_v27 = vsel %vm927_vm2, %v2217_v45, 384  ;;  %v931_v33 = vsel %vm928_vm3, %v2220_v46, 384  ;;  %v932_v57 = vsel %vm929_vm4, %v2223_v47, 384 }
 0xaa7   : > { %v933_v58 = vsel %vm709_vm1, %v930_v27, 2147483647  ;;  %v934_v59 = vsel %vm709_vm1, %v931_v33, 2147483647  ;;  %v935_v63 = vsel %vm709_vm1, %v932_v57, 2147483647 }
 0xaa8   : > { %v2555_v56 = vpop.xlane.xlu1 %1309  ;;  %vm936_vm8 = vcmp.lt.s32.totalorder %v933_v58, %v934_v59 }
 0xaa9   : > { %vm1311_vm5 = vcmp.eq.f32.partialorder %v2529_v22, %v2555_v56  ;;  %vm1312_vm6 = vcmp.eq.f32.partialorder %v2534_v49, %v2555_v56  ;;  %vm1313_vm7 = vcmp.eq.f32.partialorder %v2537_v43, %v2555_v56  ;;  %v937_v0 = vsel %vm936_vm8, %v933_v58, %v934_v59 }
 0xaaa   : > { %v1314_v60 = vsel %vm1311_vm5, %v2217_v45, 384  ;;  %v1315_v61 = vsel %vm1312_vm6, %v2220_v46, 384  ;;  %v1316_v62 = vsel %vm1313_vm7, %v2223_v47, 384  ;;  %vm938_vm9 = vcmp.lt.s32.totalorder %v937_v0, %v935_v63 }
 0xaab   : > { %v1317_v1 = vsel %vm709_vm1, %v1314_v60, 2147483647  ;;  %v1318_v2 = vsel %vm709_vm1, %v1315_v61, 2147483647  ;;  %v939_v3 = vsel %vm938_vm9, %v937_v0, %v935_v63  ;;  %v1319_v4 = vsel %vm709_vm1, %v1316_v62, 2147483647 }
 0xaac   : > { %vm1320_vm10 = vcmp.lt.s32.totalorder %v1317_v1, %v1318_v2  ;;  %v941_v6 = vshra.s32 %v939_v3, 16  ;;  %v940_v11 = vand.u32 65535, %v939_v3 }
 0xaad   : > { %v1321_v5 = vsel %vm1320_vm10, %v1317_v1, %v1318_v2 }
 0xaae   : > { %vm1322_vm11 = vcmp.lt.s32.totalorder %v1321_v5, %v1319_v4  ;;  %v943_v8 = vcvt.s32.f32 %v941_v6  ;;  %v942_v14 = vcvt.s32.f32 %v940_v11 }
 0xaaf   : > { %v1323_v7 = vsel %vm1322_vm11, %v1321_v5, %v1319_v4 }
 0xab0   : > { %v1325_v9 = vshra.s32 %v1323_v7, 16  ;;  %944 = vmin.xlane.f32.xlu0 %v943_v8  ;;  %v1324_v12 = vand.u32 65535, %v1323_v7 }
 0xab2   : > { %v1327_v10 = vcvt.s32.f32 %v1325_v9  ;;  %v1326_v17 = vcvt.s32.f32 %v1324_v12 }
 0xab4   : > { %1328 = vmin.xlane.f32.xlu1 %v1327_v10 }
 0xb39   : > { %v945_v13 = vpop.xlane.xlu0 %944 }
 0xb3a   : > { %vm946_vm12 = vcmp.eq.f32.partialorder %v943_v8, %v945_v13  ;;  %v951_v19 = vcvt.f32.s32 %v945_v13 }
 0xb3b   : > { %v947_v15 = vsel %vm946_vm12, %v942_v14, inf }
 0xb3c   : > { %948 = vmin.xlane.f32.xlu0 %v947_v15  ;;  %v952_v39 = vshll.u32 %v951_v19, 16 }
 0xb3d   : > { %v1329_v16 = vpop.xlane.xlu1 %1328 }
 0xb3e   : > { %vm1330_vm13 = vcmp.eq.f32.partialorder %v1327_v10, %v1329_v16  ;;  %v1335_v41 = vcvt.f32.s32 %v1329_v16 }
 0xb3f   : > { %v1331_v18 = vsel %vm1330_vm13, %v1326_v17, inf }
 0xb40   : > { %1332 = vmin.xlane.f32.xlu1 %v1331_v18  ;;  %v1336_v28 = vshll.u32 %v1335_v41, 16 }
 0xbc5   : > { %v949_v38 = vpop.xlane.xlu0 %948 }
 0xbc6   : > { %v950_v40 = vcvt.f32.s32 %v949_v38 }
 0xbc8   : > { %v953_v21 = vadd.s32 %v952_v39, %v950_v40 }
 0xbc9   : > { %v1333_v24 = vpop.xlane.xlu1 %1332 }
 0xbca   : > { %v1334_v30 = vcvt.f32.s32 %v1333_v24  ;;  %vm954_vm14 = vcmp.eq.s32.totalorder %v2217_v45, %v953_v21  ;;  %vm955_vm15 = vcmp.eq.s32.totalorder %v2220_v46, %v953_v21  ;;  %vm956_vm0 = vcmp.eq.s32.totalorder %v2223_v47, %v953_v21 }
 0xbcb   : > { %v2577_v37 = vsel %vm954_vm14, -inf, %v2513_v26  ;;  %v2580_v51 = vsel %vm955_vm15, -inf, %v2516_v23  ;;  %v2583_v52 = vsel %vm956_vm0, -inf, %v2519_v34 }
 0xbcc   : > { %v1337_v25 = vadd.s32 %v1336_v28, %v1334_v30  ;;  %v962_v20 = vsel %vm709_vm1, %v2577_v37, -inf  ;;  %v963_v53 = vsel %vm709_vm1, %v2580_v51, -inf  ;;  %v964_v23 = vsel %vm709_vm1, %v2583_v52, -inf }
 0xbcd   : > { %v965_v27 = vmax.f32 %v962_v20, %v963_v53 }
 0xbce   : > { %vm1338_vm2 = vcmp.eq.s32.totalorder %v2217_v45, %v1337_v25  ;;  %vm1339_vm3 = vcmp.eq.s32.totalorder %v2220_v46, %v1337_v25  ;;  %vm1340_vm4 = vcmp.eq.s32.totalorder %v2223_v47, %v1337_v25 }
 0xbcf   : > { %v2593_v26 = vsel %vm1338_vm2, inf, %v2529_v22  ;;  %v2598_v34 = vsel %vm1339_vm3, inf, %v2534_v49  ;;  %v2601_v33 = vsel %vm1340_vm4, inf, %v2537_v43  ;;  %v966_v58 = vmax.f32 %v965_v27, %v964_v23 }
 0xbd0   : > { %v1345_v57 = vsel %vm709_vm1, %v2593_v26, inf  ;;  %v1346_v59 = vsel %vm709_vm1, %v2598_v34, inf  ;;  %v1347_v22 = vsel %vm709_vm1, %v2601_v33, inf }
 0xbd1   : > { %v1348_v60 = vmin.f32 %v1345_v57, %v1346_v59  ;;  %967 = vmax.xlane.f32.xlu0 %v966_v58 }
 0xbd3   : > { %v1349_v61 = vmin.f32 %v1348_v60, %v1347_v22 }
 0xbd5   : > { %1350 = vmin.xlane.f32.xlu1 %v1349_v61 }
 0xc5a   : > { %v2609_v62 = vpop.xlane.xlu0 %967 }
 0xc5b   : > { %vm969_vm5 = vcmp.eq.f32.partialorder %v2577_v37, %v2609_v62  ;;  %vm970_vm6 = vcmp.eq.f32.partialorder %v2580_v51, %v2609_v62  ;;  %vm971_vm7 = vcmp.eq.f32.partialorder %v2583_v52, %v2609_v62 }
 0xc5c   : > { %v972_v49 = vsel %vm969_vm5, %v2217_v45, 384  ;;  %v973_v43 = vsel %vm970_vm6, %v2220_v46, 384  ;;  %v974_v0 = vsel %vm971_vm7, %v2223_v47, 384 }
 0xc5d   : > { %v975_v1 = vsel %vm709_vm1, %v972_v49, 2147483647  ;;  %v976_v2 = vsel %vm709_vm1, %v973_v43, 2147483647  ;;  %v977_v6 = vsel %vm709_vm1, %v974_v0, 2147483647 }
 0xc5e   : > { %v2619_v63 = vpop.xlane.xlu1 %1350  ;;  %vm978_vm11 = vcmp.lt.s32.totalorder %v975_v1, %v976_v2 }
 0xc5f   : > { %vm1352_vm8 = vcmp.eq.f32.partialorder %v2593_v26, %v2619_v63  ;;  %vm1353_vm9 = vcmp.eq.f32.partialorder %v2598_v34, %v2619_v63  ;;  %vm1354_vm10 = vcmp.eq.f32.partialorder %v2601_v33, %v2619_v63  ;;  %v979_v7 = vsel %vm978_vm11, %v975_v1, %v976_v2 }
 0xc60   : > { %v1355_v3 = vsel %vm1352_vm8, %v2217_v45, 384  ;;  %v1356_v4 = vsel %vm1353_vm9, %v2220_v46, 384  ;;  %v1357_v5 = vsel %vm1354_vm10, %v2223_v47, 384  ;;  %vm980_vm12 = vcmp.lt.s32.totalorder %v979_v7, %v977_v6 }
 0xc61   : > { %v1358_v8 = vsel %vm709_vm1, %v1355_v3, 2147483647  ;;  %v1359_v9 = vsel %vm709_vm1, %v1356_v4, 2147483647  ;;  %v981_v10 = vsel %vm980_vm12, %v979_v7, %v977_v6  ;;  %v1360_v11 = vsel %vm709_vm1, %v1357_v5, 2147483647 }
 0xc62   : > { %vm1361_vm13 = vcmp.lt.s32.totalorder %v1358_v8, %v1359_v9  ;;  %v983_v13 = vshra.s32 %v981_v10, 16  ;;  %v982_v18 = vand.u32 65535, %v981_v10 }
 0xc63   : > { %v1362_v12 = vsel %vm1361_vm13, %v1358_v8, %v1359_v9 }
 0xc64   : > { %vm1363_vm14 = vcmp.lt.s32.totalorder %v1362_v12, %v1360_v11  ;;  %v985_v15 = vcvt.s32.f32 %v983_v13  ;;  %v984_v38 = vcvt.s32.f32 %v982_v18 }
 0xc65   : > { %v1364_v14 = vsel %vm1363_vm14, %v1362_v12, %v1360_v11 }
 0xc66   : > { %v1366_v16 = vshra.s32 %v1364_v14, 16  ;;  %986 = vmin.xlane.f32.xlu0 %v985_v15  ;;  %v1365_v19 = vand.u32 65535, %v1364_v14 }
 0xc68   : > { %v1368_v17 = vcvt.s32.f32 %v1366_v16  ;;  %v1367_v24 = vcvt.s32.f32 %v1365_v19 }
 0xc6a   : > { %1369 = vmin.xlane.f32.xlu1 %v1368_v17 }
 0xcef   : > { %v987_v41 = vpop.xlane.xlu0 %986 }
 0xcf0   : > { %vm988_vm15 = vcmp.eq.f32.partialorder %v985_v15, %v987_v41  ;;  %v993_v21 = vcvt.f32.s32 %v987_v41 }
 0xcf1   : > { %v989_v39 = vsel %vm988_vm15, %v984_v38, inf }
 0xcf2   : > { %990 = vmin.xlane.f32.xlu0 %v989_v39  ;;  %v994_v20 = vshll.u32 %v993_v21, 16 }
 0xcf3   : > { %v1370_v40 = vpop.xlane.xlu1 %1369 }
 0xcf4   : > { %vm1371_vm0 = vcmp.eq.f32.partialorder %v1368_v17, %v1370_v40  ;;  %v1376_v30 = vcvt.f32.s32 %v1370_v40 }
 0xcf5   : > { %v1372_v28 = vsel %vm1371_vm0, %v1367_v24, inf }
 0xcf6   : > { %1373 = vmin.xlane.f32.xlu1 %v1372_v28  ;;  %v1377_v23 = vshll.u32 %v1376_v30, 16 }
 0xd7b   : > { %v991_v25 = vpop.xlane.xlu0 %990 }
 0xd7c   : > { %v992_v53 = vcvt.f32.s32 %v991_v25 }
 0xd7e   : > { %v995_v57 = vadd.s32 %v994_v20, %v992_v53 }
 0xd7f   : > { %v1374_v27 = vpop.xlane.xlu1 %1373 }
 0xd80   : > { %v1375_v58 = vcvt.f32.s32 %v1374_v27  ;;  %vm996_vm2 = vcmp.eq.s32.totalorder %v2217_v45, %v995_v57  ;;  %vm997_vm3 = vcmp.eq.s32.totalorder %v2220_v46, %v995_v57  ;;  %vm998_vm4 = vcmp.eq.s32.totalorder %v2223_v47, %v995_v57 }
 0xd81   : > { %v2641_v60 = vsel %vm996_vm2, -inf, %v2577_v37  ;;  %v2644_v22 = vsel %vm997_vm3, -inf, %v2580_v51  ;;  %v2647_v61 = vsel %vm998_vm4, -inf, %v2583_v52 }
 0xd82   : > { %v1378_v59 = vadd.s32 %v1377_v23, %v1375_v58  ;;  %v1004_v49 = vsel %vm709_vm1, %v2641_v60, -inf  ;;  %v1005_v43 = vsel %vm709_vm1, %v2644_v22, -inf  ;;  %v1006_v51 = vsel %vm709_vm1, %v2647_v61, -inf }
 0xd83   : > { %v1007_v0 = vmax.f32 %v1004_v49, %v1005_v43 }
 0xd84   : > { %vm1379_vm5 = vcmp.eq.s32.totalorder %v2217_v45, %v1378_v59  ;;  %vm1380_vm6 = vcmp.eq.s32.totalorder %v2220_v46, %v1378_v59  ;;  %vm1381_vm7 = vcmp.eq.s32.totalorder %v2223_v47, %v1378_v59 }
 0xd85   : > { %v2657_v37 = vsel %vm1379_vm5, inf, %v2593_v26  ;;  %v2662_v52 = vsel %vm1380_vm6, inf, %v2598_v34  ;;  %v2665_v1 = vsel %vm1381_vm7, inf, %v2601_v33  ;;  %v1008_v3 = vmax.f32 %v1007_v0, %v1006_v51 }
 0xd86   : > { %v1386_v2 = vsel %vm709_vm1, %v2657_v37, inf  ;;  %v1387_v4 = vsel %vm709_vm1, %v2662_v52, inf  ;;  %v1388_v26 = vsel %vm709_vm1, %v2665_v1, inf }
 0xd87   : > { %v1389_v5 = vmin.f32 %v1386_v2, %v1387_v4  ;;  %1009 = vmax.xlane.f32.xlu0 %v1008_v3 }
 0xd89   : > { %v1390_v6 = vmin.f32 %v1389_v5, %v1388_v26 }
 0xd8b   : > { %1391 = vmin.xlane.f32.xlu1 %v1390_v6 }
 0xe10   : > { %v2673_v7 = vpop.xlane.xlu0 %1009 }
 0xe11   : > { %vm1011_vm8 = vcmp.eq.f32.partialorder %v2641_v60, %v2673_v7  ;;  %vm1012_vm9 = vcmp.eq.f32.partialorder %v2644_v22, %v2673_v7  ;;  %vm1013_vm10 = vcmp.eq.f32.partialorder %v2647_v61, %v2673_v7 }
 0xe12   : > { %v1014_v34 = vsel %vm1011_vm8, %v2217_v45, 384  ;;  %v1015_v33 = vsel %vm1012_vm9, %v2220_v46, 384  ;;  %v1016_v9 = vsel %vm1013_vm10, %v2223_v47, 384 }
 0xe13   : > { %v1017_v10 = vsel %vm709_vm1, %v1014_v34, 2147483647  ;;  %v1018_v11 = vsel %vm709_vm1, %v1015_v33, 2147483647  ;;  %v1019_v15 = vsel %vm709_vm1, %v1016_v9, 2147483647 }
 0xe14   : > { %v2683_v8 = vpop.xlane.xlu1 %1391  ;;  %vm1020_vm14 = vcmp.lt.s32.totalorder %v1017_v10, %v1018_v11 }
 0xe15   : > { %vm1393_vm11 = vcmp.eq.f32.partialorder %v2657_v37, %v2683_v8  ;;  %vm1394_vm12 = vcmp.eq.f32.partialorder %v2662_v52, %v2683_v8  ;;  %vm1395_vm13 = vcmp.eq.f32.partialorder %v2665_v1, %v2683_v8  ;;  %v1021_v16 = vsel %vm1020_vm14, %v1017_v10, %v1018_v11 }
 0xe16   : > { %v1396_v12 = vsel %vm1393_vm11, %v2217_v45, 384  ;;  %v1397_v13 = vsel %vm1394_vm12, %v2220_v46, 384  ;;  %v1398_v14 = vsel %vm1395_vm13, %v2223_v47, 384  ;;  %vm1022_vm15 = vcmp.lt.s32.totalorder %v1021_v16, %v1019_v15 }
 0xe17   : > { %v1399_v17 = vsel %vm709_vm1, %v1396_v12, 2147483647  ;;  %v1400_v18 = vsel %vm709_vm1, %v1397_v13, 2147483647  ;;  %v1023_v19 = vsel %vm1022_vm15, %v1021_v16, %v1019_v15  ;;  %v1401_v41 = vsel %vm709_vm1, %v1398_v14, 2147483647 }
 0xe18   : > { %vm1402_vm0 = vcmp.lt.s32.totalorder %v1399_v17, %v1400_v18  ;;  %v1025_v39 = vshra.s32 %v1023_v19, 16  ;;  %v1024_v30 = vand.u32 65535, %v1023_v19 }
 0xe19   : > { %v1403_v38 = vsel %vm1402_vm0, %v1399_v17, %v1400_v18 }
 0xe1a   : > { %vm1404_vm2 = vcmp.lt.s32.totalorder %v1403_v38, %v1401_v41  ;;  %v1027_v24 = vcvt.s32.f32 %v1025_v39  ;;  %v1026_v53 = vcvt.s32.f32 %v1024_v30 }
 0xe1b   : > { %v1405_v40 = vsel %vm1404_vm2, %v1403_v38, %v1401_v41 }
 0xe1c   : > { %v1407_v28 = vshra.s32 %v1405_v40, 16  ;;  %1028 = vmin.xlane.f32.xlu0 %v1027_v24  ;;  %v1406_v25 = vand.u32 65535, %v1405_v40 }
 0xe1e   : > { %v1409_v21 = vcvt.s32.f32 %v1407_v28  ;;  %v1408_v57 = vcvt.s32.f32 %v1406_v25 }
 0xe20   : > { %1410 = vmin.xlane.f32.xlu1 %v1409_v21 }
 0xea5   : > { %v1029_v20 = vpop.xlane.xlu0 %1028 }
 0xea6   : > { %vm1030_vm3 = vcmp.eq.f32.partialorder %v1027_v24, %v1029_v20  ;;  %v1035_v59 = vcvt.f32.s32 %v1029_v20 }
 0xea7   : > { %v1031_v27 = vsel %vm1030_vm3, %v1026_v53, inf }
 0xea8   : > { %1032 = vmin.xlane.f32.xlu0 %v1031_v27  ;;  %v1036_v0 = vshll.u32 %v1035_v59, 16 }
 0xea9   : > { %v1411_v23 = vpop.xlane.xlu1 %1410 }
 0xeaa   : > { %vm1412_vm4 = vcmp.eq.f32.partialorder %v1409_v21, %v1411_v23  ;;  %v1417_v49 = vcvt.f32.s32 %v1411_v23 }
 0xeab   : > { %v1413_v58 = vsel %vm1412_vm4, %v1408_v57, inf }
 0xeac   : > { %1414 = vmin.xlane.f32.xlu1 %v1413_v58  ;;  %v1418_v3 = vshll.u32 %v1417_v49, 16 }
 0xf31   : > { %v1033_v43 = vpop.xlane.xlu0 %1032 }
 0xf32   : > { %v1034_v51 = vcvt.f32.s32 %v1033_v43 }
 0xf34   : > { %v1037_v4 = vadd.s32 %v1036_v0, %v1034_v51 }
 0xf35   : > { %v1415_v2 = vpop.xlane.xlu1 %1414 }
 0xf36   : > { %v1416_v5 = vcvt.f32.s32 %v1415_v2  ;;  %vm1038_vm5 = vcmp.eq.s32.totalorder %v2217_v45, %v1037_v4  ;;  %vm1039_vm6 = vcmp.eq.s32.totalorder %v2220_v46, %v1037_v4  ;;  %vm1040_vm7 = vcmp.eq.s32.totalorder %v2223_v47, %v1037_v4 }
 0xf37   : > { %v2705_v6 = vsel %vm1038_vm5, -inf, %v2641_v60  ;;  %v2708_v34 = vsel %vm1039_vm6, -inf, %v2644_v22  ;;  %v2711_v33 = vsel %vm1040_vm7, -inf, %v2647_v61 }
 0xf38   : > { %v1419_v26 = vadd.s32 %v1418_v3, %v1416_v5  ;;  %v1046_v9 = vsel %vm709_vm1, %v2705_v6, -inf  ;;  %v1047_v10 = vsel %vm709_vm1, %v2708_v34, -inf  ;;  %v1048_v22 = vsel %vm709_vm1, %v2711_v33, -inf }
 0xf39   : > { %v1049_v11 = vmax.f32 %v1046_v9, %v1047_v10 }
 0xf3a   : > { %vm1420_vm8 = vcmp.eq.s32.totalorder %v2217_v45, %v1419_v26  ;;  %vm1421_vm9 = vcmp.eq.s32.totalorder %v2220_v46, %v1419_v26  ;;  %vm1422_vm10 = vcmp.eq.s32.totalorder %v2223_v47, %v1419_v26 }
 0xf3b   : > { %v2721_v60 = vsel %vm1420_vm8, inf, %v2657_v37  ;;  %v2726_v61 = vsel %vm1421_vm9, inf, %v2662_v52  ;;  %v2729_v12 = vsel %vm1422_vm10, inf, %v2665_v1  ;;  %v1050_v14 = vmax.f32 %v1049_v11, %v1048_v22 }
 0xf3c   : > { %v1427_v13 = vsel %vm709_vm1, %v2721_v60, inf  ;;  %v1428_v15 = vsel %vm709_vm1, %v2726_v61, inf  ;;  %v1429_v37 = vsel %vm709_vm1, %v2729_v12, inf }
 0xf3d   : > { %v1430_v16 = vmin.f32 %v1427_v13, %v1428_v15  ;;  %1051 = vmax.xlane.f32.xlu0 %v1050_v14 }
 0xf3f   : > { %v1431_v17 = vmin.f32 %v1430_v16, %v1429_v37 }
 0xf41   : > { %1432 = vmin.xlane.f32.xlu1 %v1431_v17 }
 0xfc6   : > { %v2737_v18 = vpop.xlane.xlu0 %1051 }
 0xfc7   : > { %vm1053_vm11 = vcmp.eq.f32.partialorder %v2705_v6, %v2737_v18  ;;  %vm1054_vm12 = vcmp.eq.f32.partialorder %v2708_v34, %v2737_v18  ;;  %vm1055_vm13 = vcmp.eq.f32.partialorder %v2711_v33, %v2737_v18 }
 0xfc8   : > { %v1056_v52 = vsel %vm1053_vm11, %v2217_v45, 384  ;;  %v1057_v1 = vsel %vm1054_vm12, %v2220_v46, 384  ;;  %v1058_v19 = vsel %vm1055_vm13, %v2223_v47, 384 }
 0xfc9   : > { %v1059_v38 = vsel %vm709_vm1, %v1056_v52, 2147483647  ;;  %v1060_v39 = vsel %vm709_vm1, %v1057_v1, 2147483647  ;;  %v1061_v40 = vsel %vm709_vm1, %v1058_v19, 2147483647 }
 0xfca   : > { %v2748_v41 = vpop.xlane.xlu1 %1432  ;;  %vm1062_vm2 = vcmp.lt.s32.totalorder %v1059_v38, %v1060_v39 }
 0xfcb   : > { %vm1434_vm14 = vcmp.eq.f32.partialorder %v2721_v60, %v2748_v41  ;;  %vm1435_vm15 = vcmp.eq.f32.partialorder %v2726_v61, %v2748_v41  ;;  %vm1436_vm0 = vcmp.eq.f32.partialorder %v2729_v12, %v2748_v41  ;;  %v1063_v21 = vsel %vm1062_vm2, %v1059_v38, %v1060_v39 }
 0xfcc   : > { %v1437_v24 = vsel %vm1434_vm14, %v2217_v45, 384  ;;  %v1438_v28 = vsel %vm1435_vm15, %v2220_v46, 384  ;;  %v1439_v30 = vsel %vm1436_vm0, %v2223_v47, 384  ;;  %vm1064_vm3 = vcmp.lt.s32.totalorder %v1063_v21, %v1061_v40 }
 0xfcd   : > { %v1440_v25 = vsel %vm709_vm1, %v1437_v24, 2147483647  ;;  %v1441_v20 = vsel %vm709_vm1, %v1438_v28, 2147483647  ;;  %v1065_v53 = vsel %vm1064_vm3, %v1063_v21, %v1061_v40  ;;  %v1442_v23 = vsel %vm709_vm1, %v1439_v30, 2147483647 }
 0xfce   : > { %vm1443_vm4 = vcmp.lt.s32.totalorder %v1440_v25, %v1441_v20  ;;  %v1067_v27 = vshra.s32 %v1065_v53, 16  ;;  %v1066_v0 = vand.u32 65535, %v1065_v53  ;;  %vm750_vm14 = vcmp.eq.s32.totalorder %v2217_v45, 0 }
 0xfcf   : > { %v1444_v57 = vsel %vm1443_vm4, %v1440_v25, %v1441_v20  ;;  %vm792_vm15 = vcmp.eq.s32.totalorder %v2217_v45, 1  ;;  %vm834_vm0 = vcmp.eq.s32.totalorder %v2217_v45, 2  ;;  %vm876_vm2 = vcmp.eq.s32.totalorder %v2217_v45, 3 }
 0xfd0   : > { %vm1445_vm5 = vcmp.lt.s32.totalorder %v1444_v57, %v1442_v23  ;;  %v1069_v58 = vcvt.s32.f32 %v1067_v27  ;;  %v1068_v3 = vcvt.s32.f32 %v1066_v0  ;;  %vm918_vm3 = vcmp.eq.s32.totalorder %v2217_v45, 4 }
 0xfd1   : > { %v1446_v59 = vsel %vm1445_vm5, %v1444_v57, %v1442_v23  ;;  %vm960_vm4 = vcmp.eq.s32.totalorder %v2217_v45, 5  ;;  %vm1002_vm5 = vcmp.eq.s32.totalorder %v2217_v45, 6 }
 0xfd2   : > { %v1448_v49 = vshra.s32 %v1446_v59, 16  ;;  %1070 = vmin.xlane.f32.xlu0 %v1069_v58  ;;  %v1447_v51 = vand.u32 65535, %v1446_v59 }
 0xfd4   : > { %v1450_v43 = vcvt.s32.f32 %v1448_v49  ;;  %v1449_v26 = vcvt.s32.f32 %v1447_v51 }
 0xfd6   : > { %1451 = vmin.xlane.f32.xlu1 %v1450_v43 }
0x105b   : > { %v1071_v2 = vpop.xlane.xlu0 %1070 }
0x105c   : > { %vm1072_vm6 = vcmp.eq.f32.partialorder %v1069_v58, %v1071_v2  ;;  %v1077_v10 = vcvt.f32.s32 %v1071_v2 }
0x105d   : > { %v1073_v4 = vsel %vm1072_vm6, %v1068_v3, inf  ;;  %vm1044_vm6 = vcmp.eq.s32.totalorder %v2217_v45, 7 }
0x105e   : > { %1074 = vmin.xlane.f32.xlu0 %v1073_v4  ;;  %v1078_v13 = vshll.u32 %v1077_v10, 16 }
0x105f   : > { %v1452_v5 = vpop.xlane.xlu1 %1451 }
0x1060   : > { %vm1453_vm7 = vcmp.eq.f32.partialorder %v1450_v43, %v1452_v5  ;;  %v1458_v11 = vcvt.f32.s32 %v1452_v5 }
0x1061   : > { %v1454_v9 = vsel %vm1453_vm7, %v1449_v26, inf  ;;  %vm1086_vm7 = vcmp.eq.s32.totalorder %v2217_v45, 8 }
0x1062   : > { %1455 = vmin.xlane.f32.xlu1 %v1454_v9  ;;  %v1459_v37 = vshll.u32 %v1458_v11, 16 }
0x10e7   : > { %v1075_v22 = vpop.xlane.xlu0 %1074 }
0x10e8   : > { %v1076_v14 = vcvt.f32.s32 %v1075_v22 }
0x10ea   : > { %v1079_v15 = vadd.s32 %v1078_v13, %v1076_v14 }
0x10eb   : > { %v1456_v16 = vpop.xlane.xlu1 %1455 }
0x10ec   : > { %v1457_v17 = vcvt.f32.s32 %v1456_v16  ;;  %vm1080_vm8 = vcmp.eq.s32.totalorder %v2217_v45, %v1079_v15  ;;  %vm1081_vm9 = vcmp.eq.s32.totalorder %v2220_v46, %v1079_v15  ;;  %vm1082_vm10 = vcmp.eq.s32.totalorder %v2223_v47, %v1079_v15 }
0x10ed   : > { %v1083_v1 = vsel %vm1080_vm8, -inf, %v2705_v6  ;;  %v1084_v19 = vsel %vm1081_vm9, -inf, %v2708_v34  ;;  %v1085_v38 = vsel %vm1082_vm10, -inf, %v2711_v33  ;;  %vm1095_vm8 = vcmp.eq.s32.totalorder %v2217_v45, 9 }
0x10ee   : > { %v1460_v52 = vadd.s32 %v1459_v37, %v1457_v17  ;;  %v1088_v39 = vsel %vm709_vm1, %v1083_v1, -inf  ;;  %v1089_v40 = vsel %vm709_vm1, %v1084_v19, -inf  ;;  %v1090_v28 = vsel %vm709_vm1, %v1085_v38, -inf }
0x10ef   : > { %v1091_v24 = vmax.f32 %v1088_v39, %v1089_v40 }
0x10f0   : > { %vm1461_vm11 = vcmp.eq.s32.totalorder %v2217_v45, %v1460_v52  ;;  %vm1462_vm12 = vcmp.eq.s32.totalorder %v2220_v46, %v1460_v52  ;;  %vm1463_vm13 = vcmp.eq.s32.totalorder %v2223_v47, %v1460_v52  ;;  %v751_v47 = vsel %vm750_vm14, %v2225_v48, -inf }
0x10f1   : > { %v1464_v21 = vsel %vm1461_vm11, inf, %v2721_v60  ;;  %v1465_v6 = vsel %vm1462_vm12, inf, %v2726_v61  ;;  %v1466_v34 = vsel %vm1463_vm13, inf, %v2729_v12  ;;  %v1092_v33 = vmax.f32 %v1091_v24, %v1090_v28 }
0x10f2   : > { %v1468_v30 = vsel %vm709_vm1, %v1464_v21, inf  ;;  %v1469_v25 = vsel %vm709_vm1, %v1465_v6, inf  ;;  %v1470_v53 = vsel %vm709_vm1, %v1466_v34, inf  ;;  %v793_v60 = vsel %vm792_vm15, %v2289_v32, %v751_v47 }
0x10f3   : > { %v1471_v20 = vmin.f32 %v1468_v30, %v1469_v25  ;;  %1093 = vmax.xlane.f32.xlu0 %v1092_v33  ;;  %v835_v61 = vsel %vm834_vm0, %v2353_v42, %v793_v60  ;;  %v1139_v12 = vsel %vm750_vm14, %v2238_v54, inf }
0x10f4   : > { %v877_v27 = vsel %vm876_vm2, %v2417_v35, %v835_v61  ;;  %v1180_v23 = vsel %vm792_vm15, %v2302_v50, %v1139_v12 }
0x10f5   : > { %v1472_v46 = vmin.f32 %v1471_v20, %v1470_v53  ;;  %v919_v48 = vsel %vm918_vm3, %v2481_v44, %v877_v27  ;;  %v1221_v32 = vsel %vm834_vm0, %v2363_v29, %v1180_v23 }
0x10f6   : > { %v961_v57 = vsel %vm960_vm4, %v2545_v55, %v919_v48  ;;  %v1262_v42 = vsel %vm876_vm2, %v2427_v31, %v1221_v32 }
0x10f7   : > { %1473 = vmin.xlane.f32.xlu1 %v1472_v46  ;;  %v1003_v54 = vsel %vm1002_vm5, %v2609_v62, %v961_v57  ;;  %v1303_v35 = vsel %vm918_vm3, %v2491_v36, %v1262_v42 }
0x10f8   : > { %v1045_v50 = vsel %vm1044_vm6, %v2673_v7, %v1003_v54  ;;  %v1344_v44 = vsel %vm960_vm4, %v2555_v56, %v1303_v35 }
0x10f9   : > { %v1087_v58 = vsel %vm1086_vm7, %v2737_v18, %v1045_v50  ;;  %v1385_v29 = vsel %vm1002_vm5, %v2619_v63, %v1344_v44 }
0x10fa   : > { %v1426_v49 = vsel %vm1044_vm6, %v2683_v8, %v1385_v29 }
0x10fb   : > { %v1467_v31 = vsel %vm1086_vm7, %v2748_v41, %v1426_v49 }
0x117c   : > { %v1094_v59 = vpop.xlane.xlu0 %1093 }
0x117d   : > { %v1096_v55 = vsel %vm1095_vm8, %v1094_v59, %v1087_v58 }
0x117e   : > { %1097 = vst [vmem:[#allocation2] sm:$0x3] %v1096_v55  ;;  %1480 = sbr.rel (%p1723_p3) target bundleno = 4637 (0x121d), region = 56 }
0x1180   : > { %v1474_v62 = vpop.xlane.xlu1 %1473 }
0x1181   : > { %v1475_v43 = vsel %vm1095_vm8, %v1474_v62, %v1467_v31 }
0x1182   : > { %1476 = vst [vmem:[#allocation3] sm:$0x3] %v1475_v43 }
0x1183   : > { %vm1481_vm9 = vcmp.lt.s32.totalorder %v2217_v45, 10  ;;  %v1724_v56 = vld [vmem:[%s2867_s2] ss:$0 sm:$0xff]  ;;  %v1510_v3 = vstv %s1509_s22  ;;  %vm1512_vm10 = vcmask 1024  }
0x1184   : > { %v1725_v8 = vld [vmem:[%s2868_s3] ss:$0 sm:$0xff] }
0x1185   : > { %v1482_v36 = vld [vmem:[#allocation2] sm:$0x3] }
0x1186   : > { %v1483_v63 = vsel %vm1481_vm9, %v1482_v36, 0.0 }
0x1187   : > { %v1493_v18 = vmul.f32 %v1724_v56, %v1483_v63 }
0x1189   : > { %v1484_v7 = vld [vmem:[#allocation3] sm:$0x3]  ;;  %v1494_v51 = vsel %vm709_vm1, %v1493_v18, 0.0 }
0x118a   : > { %v1485_v41 = vsel %vm1481_vm9, %v1484_v7, 0.0  ;;  %1495 = vadd.xlane.f32.xlu0 %v1494_v51 }
0x118b   : > { %v1504_v0 = vmul.f32 %v1725_v8, %v1485_v41 }
0x118d   : > { %v1505_v2 = vsel %vm709_vm1, %v1504_v0, 0.0 }
0x118e   : > { %1506 = vadd.xlane.f32.xlu0 %v1505_v2 }
0x1213   : > { %v1496_v45 = vpop.xlane.xlu0 %1495 }
0x1217   : > { %v1507_v4 = vpop.xlane.xlu0 %1506 }
0x1218   : > { %v1508_v5 = vadd.f32 %v1507_v4, %v1496_v45 }
0x121a   : > { %v1511_v26 = vadd.f32 %v1510_v3, %v1508_v5 }
0x121c   : > { %1513 = vst.msk [vmem:[%s2871_s6] sm:$0x3] %vm1512_vm10, %v1511_v26 }
0x121d PF: > { %s1734_s11 = sshll.u32 %s1880_s8, 6  ;;  %s1538_s15 = sshll.u32 %s2188_s27, 4  ;;  %s1539_s15 = int_to_ptr.vmem [resolvable:$true] %s1538_s15 }
0x121e   : > { %s1536_s13 = scalar_lea.hbm %s2872_s7, %s1734_s11  ;;  %s1519_s19 = scalar_lea.sflag [#allocation8], %s2035_s26 }
0x121f   : > { %s1808_s24 = scalar_lea.vmem %s1539_s15, 64  ;;  %s1899_s12 = smov [#allocation9]  }
0x1220   : > { %p1809_p4 = scmp.ne.s32.totalorder %s1539_s15, %s1808_s24  ;;  %s1812_s14 = sshll.u32 %s1899_s12, 4  ;;  %s1813_s14 = int_to_ptr.vmem [resolvable:$false] %s1812_s14 }
0x1221   : > { %s1814_s20 = scalar_lea.vmem %s1813_s14, 128  ;;  %p1815_p7 = scmp.lt.s32.totalorder %s1539_s15, %s1813_s14 }
0x1222   : > { %p1810_p5 = pnand %p1809_p4, %p1997_p9  ;;  %p1816_p8 = scmp.lt.s32.totalorder %s1814_s20, %s1808_s24 }
0x1224   : > { %p1811_p6 = pneg %p1810_p5  ;;  %p1817_p10 = por %p1816_p8, %p1815_p7 }
0x1226   : > { %p1818_p13 = pnand %p1817_p10, %p1811_p6 }
0x1228   : > { %1821 = shalt.err (!%p1818_p13)
}
0x1229   : > { %s1822_s8 = scalar_lea.hbm %s1536_s13, 64  ;;  %s1826_s21 = scalar_lea.hbm %s2872_s7, 128 }
0x122a   : > { %p1823_p0 = scmp.ne.s32.totalorder %s1536_s13, %s1822_s8  ;;  %p1827_p3 = scmp.lt.s32.totalorder %s1536_s13, %s2872_s7 }
0x122b   : > { %p1828_p4 = scmp.lt.s32.totalorder %s1826_s21, %s1822_s8 }
0x122c   : > { %p1824_p1 = pnand %p1823_p0, %p1997_p9 }
0x122d   : > { %p1829_p5 = por %p1828_p4, %p1827_p3 }
0x122e   : > { %p1825_p2 = pneg %p1824_p1 }
0x1230   : > { %p1830_p12 = pnand %p1829_p5, %p1825_p2 }
0x1232   : > { %1833 = shalt.err (!%p1830_p12)
}
0x1233   : > { %1744 = dma.vmem_to_hbm [thread:$0]  (%p1997_p9), %s1539_s15, 64, %s1536_s13, %s1519_s19  }
0x1234 PF: > { %s1557_s25 = sand.u32 1, %s1868_s28   ;;  %p2880_p6 = scmp.ge.s32.totalorder %s1888_s10, 2 }
0x1235   : > { %s1558_s11 = scalar_lea.sflag [#allocation8], %s1557_s25 }
0x1236   : > { %p1747_p7 = pnand %p2880_p6, %p2004_p11 }
0x1238   : > { %p1748_p8 = pneg %p1747_p7 }
0x123a   : > { %1863 = dma.done.wait (%p1748_p8), %s1558_s11, 64  }
0x123b   : > { %1865 = vsyncadd (%p1748_p8), %s1558_s11, 4294967232  ;;  %s26_s10 = sadd.s32 1, %s1888_s10   ;;  %s2881_s16 = sld [smem:[#allocation15_spill]] }
0x123c   : > { %p23_p10 = scmp.ge.s32.totalorder %s26_s10, 4   ;;  %s2882_s28 = smov %s1872_s29 }
0x123d   : > { %s2883_s29 = smov %s1876_s30  ;;  %s2884_s30 = smov %s2002_s17 }
0x123e   : > { %s2885_s8 = smov %s1884_s9  ;;  %25 = sbr.rel (!%p23_p10) target bundleno = 9 (0x9), region = 116 }
0x1241   : > { %s2886_s9 = smov %s2881_s16 }
0x1243   :  { %1563 = vsyncpa [#allocation7], 1 }
0x1244   :  { %1565 = vsyncpa [#allocation7 + $0x1], 1 }
0x1245   :  { %1566 = vsyncpa [#allocation8], 1 }
0x1246   :  { %1568 = vsyncpa [#allocation8 + $0x1], 1 }

</bundles_post_ra>
